<compile_context>
chip_gen: v5e
topology: v5e:2x2
jax: 0.10.0
libtpu: 0.0.40
codegen_flags: <defaults>
</compile_context>

<pallas_src>
import math

import jax
import jax.numpy as jnp
from jax.experimental import pallas as pl
from jax.experimental.pallas import tpu as pltpu


# -----------------------------------------------------------------------------
# Architecture bookkeeping (mirrors ProdNet.__init__ / BiTreeProd.__init__)
# -----------------------------------------------------------------------------
def prodnet_dims(in_n):
    if in_n % 2 == 0:
        mid_n = 6 * in_n
        out_n = in_n // 2
    else:
        mid_n = 6 * (in_n - 1) + 2
        out_n = in_n // 2 + 1
    return mid_n, out_n


def bitree_layer_dims(in_n, num_l):
    """List of (d_in, d_out, relu_flag) for every Linear in forward order."""
    assert in_n >= 2  # num_prod == 1 would apply hidden[0] twice in the module
    num_prod = int(in_n).bit_length()
    layers = []
    cur = in_n
    for _ in range(num_prod):
        mid_n, out_n = prodnet_dims(cur)
        # ProdNet.forward: hidden[0]..hidden[num_L-1] have clamp(min=0), last one not.
        layers.append((cur, mid_n, True))
        for _ in range(1, num_l):
            layers.append((mid_n, mid_n, True))
        layers.append((mid_n, out_n, False))
        cur = out_n
    assert cur == 1  # BiTreeProd output is (N, 1)
    return layers


# -----------------------------------------------------------------------------
# Offline affine-pair fusion: (x @ Wa + ba) @ Wb + bb == x @ (Wa@Wb) + (ba@Wb + bb)
# Applies wherever a no-ReLU Linear is immediately followed by another Linear.
# -----------------------------------------------------------------------------
def fuse_affine_pairs(layer_dims, ws, bs):
    fused_dims, fused_ws, fused_bs = [], [], []
    i, n = 0, len(layer_dims)
    while i < n:
        d_in, d_out, relu = layer_dims[i]
        w, b = ws[i], bs[i]
        if (not relu) and (i + 1 < n):
            d_in2, d_out2, relu2 = layer_dims[i + 1]
            assert d_out == d_in2
            w2, b2 = ws[i + 1], bs[i + 1]
            w = w @ w2                     # f32 pre-multiply on host side
            b = b @ w2 + b2
            d_out, relu = d_out2, relu2
            i += 1
        fused_dims.append((d_in, d_out, relu))
        fused_ws.append(w)
        fused_bs.append(b)
        i += 1
    return fused_dims, fused_ws, fused_bs


# -----------------------------------------------------------------------------
# Pallas kernel: fully-unrolled stack of (x @ W + b) with static per-layer ReLU
# -----------------------------------------------------------------------------
def _make_kernel(relu_flags):
    relu_flags = tuple(bool(f) for f in relu_flags)

    def kernel(x_ref, w_ref, b_ref, o_ref):
        h = x_ref[...]                                  # (TM, D_PAD) bf16
        for layer, relu in enumerate(relu_flags):       # static unroll (9 layers)
            w = w_ref[layer]                            # (D_PAD, D_PAD) bf16, static index
            b = b_ref[layer]                            # (1, D_PAD) f32
            y = jnp.dot(h.astype(jnp.bfloat16), w,
                        preferred_element_type=jnp.float32) + b
            h = jnp.maximum(y, 0.0) if relu else y      # f32 between layers (v5e-safe)
        o_ref[...] = h.astype(o_ref.dtype)

    return kernel


def _pick_tile(batch, tm):
    """Sublane-align TM, clamp to batch, and keep >=2 grid steps (v7x has 2 TCs)."""
    rup8 = lambda v: ((v + 7) // 8) * 8
    tm = max(8, (tm // 8) * 8)
    tm = min(tm, rup8(batch))
    if batch > 8:
        tm = min(tm, rup8((batch + 1) // 2))
    return tm


def bitree_forward_pallas(x_pad, w_stack_bf16, b_stack, relu_flags, *, tm=512):
    batch, d_pad = x_pad.shape
    num_layers = w_stack_bf16.shape[0]

    tm = _pick_tile(batch, tm)
    padded_batch = -(-batch // tm) * tm
    if padded_batch != batch:
        x_pad = jnp.zeros((padded_batch, d_pad), x_pad.dtype).at[:batch].set(x_pad)

    out = pl.pallas_call(
        _make_kernel(relu_flags),
        out_shape=jax.ShapeDtypeStruct((padded_batch, d_pad), jnp.float32),
        grid_spec=pltpu.PrefetchScalarGridSpec(
            num_scalar_prefetch=0,
            grid=(padded_batch // tm,),
            in_specs=[
                # batch tile of x (bf16): pipelined / double-buffered across steps
                pl.BlockSpec((tm, d_pad), lambda i: (i, 0)),
                # stacked bf16 fused weights: constant index_map -> VMEM-resident
                pl.BlockSpec((num_layers, d_pad, d_pad), lambda i: (0, 0, 0)),
                # stacked f32 biases: also resident
                pl.BlockSpec((num_layers, 1, d_pad), lambda i: (0, 0, 0)),
            ],
            out_specs=pl.BlockSpec((tm, d_pad), lambda i: (i, 0)),
        ),
        compiler_params=pltpu.CompilerParams(
            dimension_semantics=("parallel",)),
    )(x_pad, w_stack_bf16, b_stack)
    return out[:batch]


# -----------------------------------------------------------------------------
# Deterministic parameter construction (nn.Linear-style uniform init) + packing
# -----------------------------------------------------------------------------
def make_params(key, layer_dims):
    ws, bs = [], []
    for d_in, d_out, _ in layer_dims:
        key, kw, kb = jax.random.split(key, 3)
        bound = 1.0 / math.sqrt(d_in)
        # stored as (fan_in, fan_out) so forward is x @ W + b
        ws.append(jax.random.uniform(kw, (d_in, d_out), jnp.float32, -bound, bound))
        bs.append(jax.random.uniform(kb, (d_out,), jnp.float32, -bound, bound))
    return ws, bs


def stack_params(layer_dims, ws, bs, d_pad):
    num_layers = len(layer_dims)
    w_stack = jnp.zeros((num_layers, d_pad, d_pad), jnp.float32)
    b_stack = jnp.zeros((num_layers, 1, d_pad), jnp.float32)
    for idx, ((d_in, d_out, _), w, b) in enumerate(zip(layer_dims, ws, bs)):
        w_stack = w_stack.at[idx, :d_in, :d_out].set(w)
        b_stack = b_stack.at[idx, 0, :d_out].set(b)
    return w_stack, b_stack


def reference_forward_f32(x, ws, bs, layer_dims):
    """Exact BiTreeProd forward semantics (unfused) in full f32."""
    h = x
    for (_, _, relu), w, b in zip(layer_dims, ws, bs):
        h = h @ w + b
        if relu:
            h = jnp.maximum(h, 0.0)
    return h


def reference_forward_bf16(x, ws, bs, layer_dims):
    """Pure-JAX emulation of the kernel's recipe (fused bf16 weights, f32 acc)."""
    h = x
    for (_, _, relu), w, b in zip(layer_dims, ws, bs):
        h = jnp.dot(h.astype(jnp.bfloat16), w.astype(jnp.bfloat16),
                    preferred_element_type=jnp.float32) + b
        if relu:
            h = jnp.maximum(h, 0.0)
    return h


# -----------------------------------------------------------------------------
if __name__ == "__main__":
    # Config consistent with the module: in_N=8 -> num_prod=4 ProdNets
    # (widths 8 -> 4 -> 2 -> 1 -> 1), num_L=2 -> 3 Linears each, 12 layers total,
    # fused offline to 9. BATCH/TM chosen so the grid has 2 "parallel" steps.
    IN_N = 8
    NUM_L = 2
    BATCH = 512
    D_PAD = 128   # lane-aligned common width (max real width here is 48)
    TM = 512      # tile chooser clamps to 256 -> 2 grid steps

    layer_dims = bitree_layer_dims(IN_N, NUM_L)          # 12 Linears
    key = jax.random.PRNGKey(0)
    key, kx = jax.random.split(key)
    x = jax.random.normal(kx, (BATCH, IN_N), jnp.float32)

    ws, bs = make_params(key, layer_dims)                # unfused f32 params
    f_dims, f_ws, f_bs = fuse_affine_pairs(layer_dims, ws, bs)   # 9 fused layers
    relu_flags = [r for (_, _, r) in f_dims]

    w_stack, b_stack = stack_params(f_dims, f_ws, f_bs, D_PAD)
    w_stack_bf16 = w_stack.astype(jnp.bfloat16)

    # Zero-pad input features to D_PAD lanes and pre-cast to bf16 (half the DMA;
    # identical numerics since the kernel cast to bf16 before the first dot anyway).
    x_pad = jnp.zeros((BATCH, D_PAD), jnp.bfloat16).at[:, :IN_N].set(
        x.astype(jnp.bfloat16))

    out_pad = bitree_forward_pallas(x_pad, w_stack_bf16, b_stack, relu_flags, tm=TM)
    out_pad = jax.block_until_ready(out_pad)
    out = out_pad[:, :1]  # BiTreeProd output is (N, 1)
    assert out.shape == (BATCH, 1)

    # Tight check vs a pure-JAX emulation of the kernel's exact precision recipe
    # (fused bf16 weights, f32 accumulation). Tolerance loosened per review.
    ref_bf16 = reference_forward_bf16(x, f_ws, f_bs, f_dims)
    assert jnp.allclose(out, ref_bf16, atol=2e-3, rtol=2e-3)

    # Semantics check vs the full-f32, unfused module forward (bf16-weight drift only).
    ref_f32 = reference_forward_f32(x, ws, bs, layer_dims)
    assert jnp.allclose(out, ref_f32, atol=1e-1, rtol=1e-1)

    print("KERNEL_OK")
</pallas_src>

<mosaic_0001>
module attributes {stable_mosaic.version = 11 : i64} {
  func.func @kernel(%arg0: i32, %arg1: memref<256x128xbf16, #tpu.memory_space<vmem>>, %arg2: memref<9x128x128xbf16, #tpu.memory_space<vmem>>, %arg3: memref<9x1x128xf32, #tpu.memory_space<vmem>>, %arg4: memref<256x128xf32, #tpu.memory_space<vmem>>) attributes {dimension_semantics = [#tpu.dimension_semantics<parallel>], iteration_bounds = array<i64: 2>, scalar_prefetch = 0 : i64, scratch_operands = 0 : i64, tpu.core_type = #tpu.core_type<tc>, window_params = [{transform_indices = @transform_0, window_bounds = array<i64: 256, 128>}, {pipeline_mode = #tpu.pipeline_mode<synchronous>, transform_indices = @transform_1, window_bounds = array<i64: 9, 128, 128>}, {pipeline_mode = #tpu.pipeline_mode<synchronous>, transform_indices = @transform_2, window_bounds = array<i64: 9, 1, 128>}, {transform_indices = @transform_3, window_bounds = array<i64: 256, 128>}]} {
    %c0 = arith.constant 0 : index
    %c0_0 = arith.constant 0 : index
    %0 = vector.load %arg1[%c0, %c0_0] : memref<256x128xbf16, #tpu.memory_space<vmem>>, vector<256x128xbf16>
    %c0_1 = arith.constant 0 : index
    %c0_2 = arith.constant 0 : index
    %c0_3 = arith.constant 0 : index
    %1 = vector.load %arg2[%c0_1, %c0_2, %c0_3] : memref<9x128x128xbf16, #tpu.memory_space<vmem>>, vector<1x128x128xbf16>
    %2 = vector.shape_cast %1 : vector<1x128x128xbf16> to vector<128x128xbf16>
    %c0_4 = arith.constant 0 : index
    %c0_5 = arith.constant 0 : index
    %c0_6 = arith.constant 0 : index
    %3 = vector.load %arg3[%c0_4, %c0_5, %c0_6] : memref<9x1x128xf32, #tpu.memory_space<vmem>>, vector<1x1x128xf32>
    %4 = vector.shape_cast %3 : vector<1x1x128xf32> to vector<1x128xf32>
    %cst = arith.constant dense<0.000000e+00> : vector<256x128xf32>
    %5 = tpu.matmul %0, %2, %cst {dimension_numbers = #tpu.dot_dimension_numbers<[1], [0], [0], [1], [0, 0, 1, 1], [], []>} : vector<256x128xbf16>, vector<128x128xbf16>, vector<256x128xf32> -> vector<256x128xf32>
    %6 = vector.broadcast %4 : vector<1x128xf32> to vector<256x128xf32>
    %7 = arith.addf %5, %6 : vector<256x128xf32>
    %cst_7 = arith.constant 0.000000e+00 : f32
    %8 = vector.broadcast %cst_7 : f32 to vector<256x128xf32>
    %9 = arith.maximumf %7, %8 : vector<256x128xf32>
    %c1 = arith.constant 1 : index
    %c0_8 = arith.constant 0 : index
    %c0_9 = arith.constant 0 : index
    %10 = vector.load %arg2[%c1, %c0_8, %c0_9] : memref<9x128x128xbf16, #tpu.memory_space<vmem>>, vector<1x128x128xbf16>
    %11 = vector.shape_cast %10 : vector<1x128x128xbf16> to vector<128x128xbf16>
    %c1_10 = arith.constant 1 : index
    %c0_11 = arith.constant 0 : index
    %c0_12 = arith.constant 0 : index
    %12 = vector.load %arg3[%c1_10, %c0_11, %c0_12] : memref<9x1x128xf32, #tpu.memory_space<vmem>>, vector<1x1x128xf32>
    %13 = vector.shape_cast %12 : vector<1x1x128xf32> to vector<1x128xf32>
    %14 = arith.truncf %9 : vector<256x128xf32> to vector<256x128xbf16>
    %cst_13 = arith.constant dense<0.000000e+00> : vector<256x128xf32>
    %15 = tpu.matmul %14, %11, %cst_13 {dimension_numbers = #tpu.dot_dimension_numbers<[1], [0], [0], [1], [0, 0, 1, 1], [], []>} : vector<256x128xbf16>, vector<128x128xbf16>, vector<256x128xf32> -> vector<256x128xf32>
    %16 = vector.broadcast %13 : vector<1x128xf32> to vector<256x128xf32>
    %17 = arith.addf %15, %16 : vector<256x128xf32>
    %cst_14 = arith.constant 0.000000e+00 : f32
    %18 = vector.broadcast %cst_14 : f32 to vector<256x128xf32>
    %19 = arith.maximumf %17, %18 : vector<256x128xf32>
    %c2 = arith.constant 2 : index
    %c0_15 = arith.constant 0 : index
    %c0_16 = arith.constant 0 : index
    %20 = vector.load %arg2[%c2, %c0_15, %c0_16] : memref<9x128x128xbf16, #tpu.memory_space<vmem>>, vector<1x128x128xbf16>
    %21 = vector.shape_cast %20 : vector<1x128x128xbf16> to vector<128x128xbf16>
    %c2_17 = arith.constant 2 : index
    %c0_18 = arith.constant 0 : index
    %c0_19 = arith.constant 0 : index
    %22 = vector.load %arg3[%c2_17, %c0_18, %c0_19] : memref<9x1x128xf32, #tpu.memory_space<vmem>>, vector<1x1x128xf32>
    %23 = vector.shape_cast %22 : vector<1x1x128xf32> to vector<1x128xf32>
    %24 = arith.truncf %19 : vector<256x128xf32> to vector<256x128xbf16>
    %cst_20 = arith.constant dense<0.000000e+00> : vector<256x128xf32>
    %25 = tpu.matmul %24, %21, %cst_20 {dimension_numbers = #tpu.dot_dimension_numbers<[1], [0], [0], [1], [0, 0, 1, 1], [], []>} : vector<256x128xbf16>, vector<128x128xbf16>, vector<256x128xf32> -> vector<256x128xf32>
    %26 = vector.broadcast %23 : vector<1x128xf32> to vector<256x128xf32>
    %27 = arith.addf %25, %26 : vector<256x128xf32>
    %cst_21 = arith.constant 0.000000e+00 : f32
    %28 = vector.broadcast %cst_21 : f32 to vector<256x128xf32>
    %29 = arith.maximumf %27, %28 : vector<256x128xf32>
    %c3 = arith.constant 3 : index
    %c0_22 = arith.constant 0 : index
    %c0_23 = arith.constant 0 : index
    %30 = vector.load %arg2[%c3, %c0_22, %c0_23] : memref<9x128x128xbf16, #tpu.memory_space<vmem>>, vector<1x128x128xbf16>
    %31 = vector.shape_cast %30 : vector<1x128x128xbf16> to vector<128x128xbf16>
    %c3_24 = arith.constant 3 : index
    %c0_25 = arith.constant 0 : index
    %c0_26 = arith.constant 0 : index
    %32 = vector.load %arg3[%c3_24, %c0_25, %c0_26] : memref<9x1x128xf32, #tpu.memory_space<vmem>>, vector<1x1x128xf32>
    %33 = vector.shape_cast %32 : vector<1x1x128xf32> to vector<1x128xf32>
    %34 = arith.truncf %29 : vector<256x128xf32> to vector<256x128xbf16>
    %cst_27 = arith.constant dense<0.000000e+00> : vector<256x128xf32>
    %35 = tpu.matmul %34, %31, %cst_27 {dimension_numbers = #tpu.dot_dimension_numbers<[1], [0], [0], [1], [0, 0, 1, 1], [], []>} : vector<256x128xbf16>, vector<128x128xbf16>, vector<256x128xf32> -> vector<256x128xf32>
    %36 = vector.broadcast %33 : vector<1x128xf32> to vector<256x128xf32>
    %37 = arith.addf %35, %36 : vector<256x128xf32>
    %cst_28 = arith.constant 0.000000e+00 : f32
    %38 = vector.broadcast %cst_28 : f32 to vector<256x128xf32>
    %39 = arith.maximumf %37, %38 : vector<256x128xf32>
    %c4 = arith.constant 4 : index
    %c0_29 = arith.constant 0 : index
    %c0_30 = arith.constant 0 : index
    %40 = vector.load %arg2[%c4, %c0_29, %c0_30] : memref<9x128x128xbf16, #tpu.memory_space<vmem>>, vector<1x128x128xbf16>
    %41 = vector.shape_cast %40 : vector<1x128x128xbf16> to vector<128x128xbf16>
    %c4_31 = arith.constant 4 : index
    %c0_32 = arith.constant 0 : index
    %c0_33 = arith.constant 0 : index
    %42 = vector.load %arg3[%c4_31, %c0_32, %c0_33] : memref<9x1x128xf32, #tpu.memory_space<vmem>>, vector<1x1x128xf32>
    %43 = vector.shape_cast %42 : vector<1x1x128xf32> to vector<1x128xf32>
    %44 = arith.truncf %39 : vector<256x128xf32> to vector<256x128xbf16>
    %cst_34 = arith.constant dense<0.000000e+00> : vector<256x128xf32>
    %45 = tpu.matmul %44, %41, %cst_34 {dimension_numbers = #tpu.dot_dimension_numbers<[1], [0], [0], [1], [0, 0, 1, 1], [], []>} : vector<256x128xbf16>, vector<128x128xbf16>, vector<256x128xf32> -> vector<256x128xf32>
    %46 = vector.broadcast %43 : vector<1x128xf32> to vector<256x128xf32>
    %47 = arith.addf %45, %46 : vector<256x128xf32>
    %cst_35 = arith.constant 0.000000e+00 : f32
    %48 = vector.broadcast %cst_35 : f32 to vector<256x128xf32>
    %49 = arith.maximumf %47, %48 : vector<256x128xf32>
    %c5 = arith.constant 5 : index
    %c0_36 = arith.constant 0 : index
    %c0_37 = arith.constant 0 : index
    %50 = vector.load %arg2[%c5, %c0_36, %c0_37] : memref<9x128x128xbf16, #tpu.memory_space<vmem>>, vector<1x128x128xbf16>
    %51 = vector.shape_cast %50 : vector<1x128x128xbf16> to vector<128x128xbf16>
    %c5_38 = arith.constant 5 : index
    %c0_39 = arith.constant 0 : index
    %c0_40 = arith.constant 0 : index
    %52 = vector.load %arg3[%c5_38, %c0_39, %c0_40] : memref<9x1x128xf32, #tpu.memory_space<vmem>>, vector<1x1x128xf32>
    %53 = vector.shape_cast %52 : vector<1x1x128xf32> to vector<1x128xf32>
    %54 = arith.truncf %49 : vector<256x128xf32> to vector<256x128xbf16>
    %cst_41 = arith.constant dense<0.000000e+00> : vector<256x128xf32>
    %55 = tpu.matmul %54, %51, %cst_41 {dimension_numbers = #tpu.dot_dimension_numbers<[1], [0], [0], [1], [0, 0, 1, 1], [], []>} : vector<256x128xbf16>, vector<128x128xbf16>, vector<256x128xf32> -> vector<256x128xf32>
    %56 = vector.broadcast %53 : vector<1x128xf32> to vector<256x128xf32>
    %57 = arith.addf %55, %56 : vector<256x128xf32>
    %cst_42 = arith.constant 0.000000e+00 : f32
    %58 = vector.broadcast %cst_42 : f32 to vector<256x128xf32>
    %59 = arith.maximumf %57, %58 : vector<256x128xf32>
    %c6 = arith.constant 6 : index
    %c0_43 = arith.constant 0 : index
    %c0_44 = arith.constant 0 : index
    %60 = vector.load %arg2[%c6, %c0_43, %c0_44] : memref<9x128x128xbf16, #tpu.memory_space<vmem>>, vector<1x128x128xbf16>
    %61 = vector.shape_cast %60 : vector<1x128x128xbf16> to vector<128x128xbf16>
    %c6_45 = arith.constant 6 : index
    %c0_46 = arith.constant 0 : index
    %c0_47 = arith.constant 0 : index
    %62 = vector.load %arg3[%c6_45, %c0_46, %c0_47] : memref<9x1x128xf32, #tpu.memory_space<vmem>>, vector<1x1x128xf32>
    %63 = vector.shape_cast %62 : vector<1x1x128xf32> to vector<1x128xf32>
    %64 = arith.truncf %59 : vector<256x128xf32> to vector<256x128xbf16>
    %cst_48 = arith.constant dense<0.000000e+00> : vector<256x128xf32>
    %65 = tpu.matmul %64, %61, %cst_48 {dimension_numbers = #tpu.dot_dimension_numbers<[1], [0], [0], [1], [0, 0, 1, 1], [], []>} : vector<256x128xbf16>, vector<128x128xbf16>, vector<256x128xf32> -> vector<256x128xf32>
    %66 = vector.broadcast %63 : vector<1x128xf32> to vector<256x128xf32>
    %67 = arith.addf %65, %66 : vector<256x128xf32>
    %cst_49 = arith.constant 0.000000e+00 : f32
    %68 = vector.broadcast %cst_49 : f32 to vector<256x128xf32>
    %69 = arith.maximumf %67, %68 : vector<256x128xf32>
    %c7 = arith.constant 7 : index
    %c0_50 = arith.constant 0 : index
    %c0_51 = arith.constant 0 : index
    %70 = vector.load %arg2[%c7, %c0_50, %c0_51] : memref<9x128x128xbf16, #tpu.memory_space<vmem>>, vector<1x128x128xbf16>
    %71 = vector.shape_cast %70 : vector<1x128x128xbf16> to vector<128x128xbf16>
    %c7_52 = arith.constant 7 : index
    %c0_53 = arith.constant 0 : index
    %c0_54 = arith.constant 0 : index
    %72 = vector.load %arg3[%c7_52, %c0_53, %c0_54] : memref<9x1x128xf32, #tpu.memory_space<vmem>>, vector<1x1x128xf32>
    %73 = vector.shape_cast %72 : vector<1x1x128xf32> to vector<1x128xf32>
    %74 = arith.truncf %69 : vector<256x128xf32> to vector<256x128xbf16>
    %cst_55 = arith.constant dense<0.000000e+00> : vector<256x128xf32>
    %75 = tpu.matmul %74, %71, %cst_55 {dimension_numbers = #tpu.dot_dimension_numbers<[1], [0], [0], [1], [0, 0, 1, 1], [], []>} : vector<256x128xbf16>, vector<128x128xbf16>, vector<256x128xf32> -> vector<256x128xf32>
    %76 = vector.broadcast %73 : vector<1x128xf32> to vector<256x128xf32>
    %77 = arith.addf %75, %76 : vector<256x128xf32>
    %cst_56 = arith.constant 0.000000e+00 : f32
    %78 = vector.broadcast %cst_56 : f32 to vector<256x128xf32>
    %79 = arith.maximumf %77, %78 : vector<256x128xf32>
    %c8 = arith.constant 8 : index
    %c0_57 = arith.constant 0 : index
    %c0_58 = arith.constant 0 : index
    %80 = vector.load %arg2[%c8, %c0_57, %c0_58] : memref<9x128x128xbf16, #tpu.memory_space<vmem>>, vector<1x128x128xbf16>
    %81 = vector.shape_cast %80 : vector<1x128x128xbf16> to vector<128x128xbf16>
    %c8_59 = arith.constant 8 : index
    %c0_60 = arith.constant 0 : index
    %c0_61 = arith.constant 0 : index
    %82 = vector.load %arg3[%c8_59, %c0_60, %c0_61] : memref<9x1x128xf32, #tpu.memory_space<vmem>>, vector<1x1x128xf32>
    %83 = vector.shape_cast %82 : vector<1x1x128xf32> to vector<1x128xf32>
    %84 = arith.truncf %79 : vector<256x128xf32> to vector<256x128xbf16>
    %cst_62 = arith.constant dense<0.000000e+00> : vector<256x128xf32>
    %85 = tpu.matmul %84, %81, %cst_62 {dimension_numbers = #tpu.dot_dimension_numbers<[1], [0], [0], [1], [0, 0, 1, 1], [], []>} : vector<256x128xbf16>, vector<128x128xbf16>, vector<256x128xf32> -> vector<256x128xf32>
    %86 = vector.broadcast %83 : vector<1x128xf32> to vector<256x128xf32>
    %87 = arith.addf %85, %86 : vector<256x128xf32>
    %c0_63 = arith.constant 0 : index
    %c0_64 = arith.constant 0 : index
    %88 = vector.load %arg4[%c0_63, %c0_64] : memref<256x128xf32, #tpu.memory_space<vmem>>, vector<256x128xf32>
    tpu.vector_store %arg4[%c0_63, %c0_64], %87 {strides = array<i32>} : memref<256x128xf32, #tpu.memory_space<vmem>>, vector<256x128xf32>,
    return
  }
  func.func @transform_0(%arg0: i32) -> (i32, i32) {
    %c0_i32 = arith.constant 0 : i32
    %c0_i32_0 = arith.constant 0 : i32
    return %arg0, %c0_i32 : i32, i32
  }
  func.func @transform_1(%arg0: i32) -> (i32, i32, i32) {
    %c0_i32 = arith.constant 0 : i32
    %c0_i32_0 = arith.constant 0 : i32
    %c0_i32_1 = arith.constant 0 : i32
    %c0_i32_2 = arith.constant 0 : i32
    return %c0_i32, %c0_i32_0, %c0_i32_1 : i32, i32, i32
  }
  func.func @transform_2(%arg0: i32) -> (i32, i32, i32) {
    %c0_i32 = arith.constant 0 : i32
    %c0_i32_0 = arith.constant 0 : i32
    %c0_i32_1 = arith.constant 0 : i32
    %c0_i32_2 = arith.constant 0 : i32
    return %c0_i32, %c0_i32_0, %c0_i32_1 : i32, i32, i32
  }
  func.func @transform_3(%arg0: i32) -> (i32, i32) {
    %c0_i32 = arith.constant 0 : i32
    %c0_i32_0 = arith.constant 0 : i32
    return %arg0, %c0_i32 : i32, i32
  }
}

</mosaic_0001>

<bundles_post_ra>
// kernel: tpu_custom_call.1
= control target key start
LH: loop header
LB: loop body
LE: loop exit
PB: predicated region body
PF: predicated region fallthrough
CT: control target
= control target key end

     0   :  { %8 = vsyncpa [#allocation3], 0  ;;  %s3570_s0 = inlined_call_operand.hbm [shape: bf16[512,128], index: 0, kind: input, shape index: {}]   ;;  %s3571_s1 = inlined_call_operand.hbm [shape: bf16[9,128,128], index: 1, kind: input, shape index: {}]   ;;  %s3572_s2 = inlined_call_operand.hbm [shape: f32[9,1,128], index: 2, kind: input, shape index: {}]   ;;  %s3573_s3 = inlined_call_operand.hbm [shape: f32[512,128], index: 3, kind: output, shape index: {}]  }
   0x1   :  { %10 = vsyncpa [#allocation3 + $0x1], 0 }
   0x2   :  { %11 = vsyncpa [#allocation6], 0 }
   0x3   :  { %12 = vsyncpa [#allocation4], 0 }
   0x4   :  { %14 = vsyncpa [#allocation4 + $0x1], 0  ;;  %s3063_s12 = smov 0   ;;  %s3065_s13 = smov 0  }
   0x5   :  { %s3067_s14 = smov 0   ;;  %s3069_s15 = smov 0  }
   0x6 LB: > { %s3084_s16 = sadd.s32 4294967295, %s3033_s15   ;;  %s2307_s17 = sadd.s32 4294967294, %s3033_s15   ;;  %s3033_s15 = sphi %s3069_s15, %s3583_s15   ;;  %s3029_s14 = sphi %s3067_s14, %s3582_s14   ;;  %s3025_s13 = sphi %s3065_s13, %s3581_s13   ;;  %s3021_s12 = sphi %s3063_s12, %s3580_s12  }
   0x7   : > { %p40_p0 = scmp.ne.s32.totalorder %s3025_s13, %s3021_s12  ;;  %p41_p1 = scmp.eq.s32.totalorder %s3084_s16, 0 }
   0x8   : > { %p106_p2 = scmp.eq.s32.totalorder %s3084_s16, 1  ;;  %p112_p3 = scmp.eq.s32.totalorder %s2307_s17, 1 }
   0x9   : > { %p3093_p4 = por %p41_p1, %p40_p0  ;;  %p2308_p5 = scmp.ge.s32.totalorder %s3033_s15, 1 }
   0xa   : > { %p3098_p6 = por %p112_p3, %p40_p0  ;;  %p119_p7 = scmp.lt.s32.totalorder %s3033_s15, 3 }
   0xb   : > { %s130_s22 = sshll.u32 %s3571_s1, 4  ;;  %s3035_s24 = smov [#allocation5]   ;;  %s131_s22 = int_to_ptr.hbm [resolvable:$true] %s130_s22 }
   0xc   : > { %p3106_p8 = pnand %p2308_p5, %p119_p7  ;;  %s132_s25 = sshll.u32 %s3035_s24, 4  ;;  %s133_s25 = int_to_ptr.vmem [resolvable:$true] %s132_s25 }
   0xd   : > { %s144_s28 = sshll.u32 %s3572_s2, 4  ;;  %s3036_s29 = smov 64   ;;  %s145_s28 = int_to_ptr.hbm [resolvable:$true] %s144_s28 }
   0xe   : > { %p2803_p9 = pneg %p3106_p8  ;;  %s3037_s30 = smov 4  }
   0xf   : > { %s3038_s4 = smov [#allocation7]   ;;  %s3039_s6 = smov 16  }
  0x10   : > { %p2804_p10 = pnand %p2803_p9, %p41_p1  ;;  %s146_s5 = sshll.u32 %s3038_s4, 4  ;;  %s147_s5 = int_to_ptr.vmem [resolvable:$true] %s146_s5 }
  0x11   : > { %s3040_s7 = smov 1   ;;  %s3122_s8 = sadd.s32 1, %s3033_s15  }
  0x12   : > { %2806 = dma.hbm_to_vmem [thread:$0]  (!%p2804_p10), %s131_s22, 9216, %s133_s25, [#allocation6], %s3036_s29, %s3036_s29, %s3037_s30  }
  0x13   : > { %2809 = dma.hbm_to_vmem [thread:$0]  (!%p2804_p10), %s145_s28, 144, %s147_s5, [#allocation6], %s3039_s6, %s3039_s6, %s3040_s7  }
  0x14   : > { %s24_s9 = ssub.s32 %s3033_s15, %s3122_s8  ;;  %s27_s10 = sadd.s32 1, %s3029_s14 }
  0x15   : > { %p25_p12 = scmp.eq.s32.totalorder %s24_s9, 0  ;;  %p34_p13 = scmp.ne.s32.totalorder %s3029_s14, %s3025_s13 }
  0x16   : > { %p35_p0 = scmp.eq.s32.totalorder %s3033_s15, 0  ;;  %p2820_p7 = scmp.lt.s32.totalorder %s3033_s15, 2 }
  0x17   : > { %s3131_s11 = scalar_select %p25_p12, %s3029_s14, %s27_s10  }
  0x18   : > { %p36_p3 = por %p35_p0, %p34_p13  ;;  %p3135_p5 = por %p106_p2, %p34_p13 }
  0x19   : > { %s160_s20 = sand.u32 1, %s3029_s14   ;;  %s2677_s22 = sshll.u32 %s3033_s15, 7 }
  0x1a   : > { %s2312_s21 = sshll.u32 %s160_s20, 7  ;;  %s169_s26 = scalar_lea.hbm %s3570_s0, %s2677_s22 }
  0x1b   : > { %s164_s27 = scalar_lea.vmem [#allocation2], %s2312_s21  ;;  %s170_s4 = sshll.u32 %s169_s26, 4  ;;  %s171_s4 = int_to_ptr.hbm [resolvable:$true] %s170_s4 }
  0x1c   : > { %s172_s28 = sshll.u32 %s164_s27, 4  ;;  %p3145_p9 = pnand %p2820_p7, %p36_p3  ;;  %s173_s28 = int_to_ptr.vmem [resolvable:$true] %s172_s28 }
  0x1d   : > { %s161_s6 = scalar_lea.sflag [#allocation3], %s160_s20  ;;  %s2933_s7 = sshra.s32 %s171_s4, 4  ;;  %s2934_s7 = int_to_ptr.hbm [resolvable:$true] %s2933_s7 }
  0x1e   : > { %s2935_s9 = scalar_lea.hbm %s2934_s7, 128  ;;  %p2937_p10 = pneg %p3145_p9 }
  0x1f   : > { %p2936_p2 = scmp.ne.s32.totalorder %s2934_s7, %s2935_s9  ;;  %s2940_s22 = scalar_lea.hbm %s3570_s0, 256 }
  0x20   : > { %p2941_p0 = scmp.lt.s32.totalorder %s2934_s7, %s3570_s0  ;;  %p2942_p3 = scmp.lt.s32.totalorder %s2940_s22, %s2935_s9 }
  0x21   : > { %p2938_p12 = pnand %p2937_p10, %p2936_p2 }
  0x22   : > { %p2943_p7 = por %p2942_p3, %p2941_p0 }
  0x23   : > { %p2939_p13 = pneg %p2938_p12 }
  0x25   : > { %p2944_p11 = pnand %p2943_p7, %p2939_p13 }
  0x27   : > { %2947 = shalt.err (!%p2944_p11)
}
  0x28   : > { %2813 = dma.hbm_to_vmem [thread:$0]  (!%p3145_p9), %s171_s4, 2048, %s173_s28, %s161_s6, %s3036_s29, %s3036_s29, %s3037_s30  }
  0x29   : > { %184 = sbr.rel (%p3106_p8) target bundleno = 1605 (0x645), region = 32  ;;  %s3165_s20 = sand.u32 (!%p3106_p8), 1, %s3025_s13  }
  0x2a   : > { %s2316_s26 = sshll.u32 (!%p3106_p8), %s3165_s20, 7  ;;  %s187_s27 = scalar_lea.sflag (!%p3106_p8), [#allocation3], %s3165_s20 }
  0x2b   : > { %s3169_s7 = scalar_lea.vmem (!%p3106_p8), [#allocation2], %s2316_s26 }
  0x2e   : > { %3008 = dma.done.wait (%p3093_p4), %s187_s27, 2048  }
  0x2f   : > { %3010 = vsyncadd (%p3093_p4), %s187_s27, 4294965248 }
  0x30   : > { %3012 = dma.done.wait (%p41_p1), [#allocation6], 9360  }
  0x31   : > { %3014 = vsyncadd (%p41_p1), [#allocation6], 4294957936  ;;  %v2701_v0 = vld [vmem:[#allocation5 + $0x38] sm:$0xff]  ;;  %v2700_v1 = vld [vmem:[#allocation5 + $0x30] sm:$0xff]  ;;  %s2319_s18 = sshll.u32 %s3165_s20, 8  ;;  %s2766_s29 = sshll.u32 %s3084_s16, 8 }
  0x32   : > { %422 = vmatpush.bf16.msra.mxu0 %v2701_v0  ;;  %2767 = vmatpush.bf16.msra.mxu1 %v2701_v0  ;;  %v2699_v2 = vld [vmem:[#allocation5 + $0x28] sm:$0xff]  ;;  %v2698_v3 = vld [vmem:[#allocation5 + $0x20] sm:$0xff]  ;;  %v2697_v4 = vld [vmem:[#allocation5 + $0x18] sm:$0xff]  ;;  %s3457_s23 = scalar_lea.vmem [#allocation8], %s2319_s18  ;;  %s2211_s4 = scalar_lea.hbm %s3573_s3, %s2766_s29 }
  0x33   : > { %2768 = vmatpush.bf16.msra.mxu2 %v2701_v0  ;;  %2769 = vmatpush.bf16.msra.mxu3 %v2701_v0  ;;  %v2696_v5 = vld [vmem:[#allocation5 + $0x10] sm:$0xff]  ;;  %v2695_v6 = vld [vmem:[#allocation5 + $0x8] sm:$0xff]  ;;  %v2694_v7 = vld [vmem:[#allocation5] sm:$0xff]  ;;  %s2212_s5 = sshll.u32 %s3457_s23, 4  ;;  %s2214_s6 = sshll.u32 %s2211_s4, 4  ;;  %s2213_s5 = int_to_ptr.vmem [resolvable:$true] %s2212_s5  ;;  %s2215_s6 = int_to_ptr.hbm [resolvable:$true] %s2214_s6 }
  0x34   : > { %v2678_v8 = vld [vmem:[%s3169_s7] sm:$0xff]  ;;  %v2679_v9 = vld [vmem:[%s3169_s7 + $0x8] sm:$0xff]  ;;  %v2709_v11 = vld [vmem:[#allocation5 + $0x78] sm:$0xff]  ;;  %s2200_s9 = scalar_lea.sflag [#allocation4], %s3165_s20  ;;  %s2977_s10 = sshra.s32 %s2215_s6, 4  ;;  %s2978_s10 = int_to_ptr.hbm [resolvable:$true] %s2977_s10 }
  0x35   : > { %v2682_v10 = vld [vmem:[%s3169_s7 + $0x20] sm:$0xff]  ;;  %v2708_v12 = vld [vmem:[#allocation5 + $0x70] sm:$0xff]  ;;  %v2707_v13 = vld [vmem:[#allocation5 + $0x68] sm:$0xff]  ;;  %s2979_s16 = scalar_lea.hbm %s2978_s10, 256  ;;  %s2983_s24 = scalar_lea.hbm %s3573_s3, 512 }
  0x36   : > { %423 = vmatpush.bf16.msra.mxu0 %v2700_v1  ;;  %2770 = vmatpush.bf16.msra.mxu1 %v2700_v1  ;;  %v2706_v14 = vld [vmem:[#allocation5 + $0x60] sm:$0xff]  ;;  %v2680_v15 = vld [vmem:[%s3169_s7 + $0x10] sm:$0xff]  ;;  %v2683_v16 = vld [vmem:[%s3169_s7 + $0x28] sm:$0xff]  ;;  %p2980_p1 = scmp.ne.s32.totalorder %s2978_s10, %s2979_s16  ;;  %p2984_p11 = scmp.lt.s32.totalorder %s2978_s10, %s3573_s3 }
  0x37   : > { %2771 = vmatpush.bf16.msra.mxu2 %v2700_v1  ;;  %2772 = vmatpush.bf16.msra.mxu3 %v2700_v1  ;;  %v2705_v17 = vld [vmem:[#allocation5 + $0x58] sm:$0xff]  ;;  %v2686_v18 = vld [vmem:[%s3169_s7 + $0x40] sm:$0xff]  ;;  %v2704_v19 = vld [vmem:[#allocation5 + $0x50] sm:$0xff]  ;;  %p2985_p9 = scmp.lt.s32.totalorder %s2983_s24, %s2979_s16 }
  0x38   : > { %v2703_v20 = vld [vmem:[#allocation5 + $0x48] sm:$0xff]  ;;  %v2681_v21 = vld [vmem:[%s3169_s7 + $0x18] sm:$0xff]  ;;  %v2684_v22 = vld [vmem:[%s3169_s7 + $0x30] sm:$0xff]  ;;  %p2981_p4 = pnand %p2980_p1, %p3135_p5 }
  0x39   : > { %v2685_v23 = vld [vmem:[%s3169_s7 + $0x38] sm:$0xff]  ;;  %v2687_v24 = vld [vmem:[%s3169_s7 + $0x48] sm:$0xff]  ;;  %v2702_v25 = vld [vmem:[#allocation5 + $0x40] sm:$0xff]  ;;  %p2986_p2 = por %p2985_p9, %p2984_p11 }
  0x3a   : > { %424 = vmatpush.bf16.msra.mxu0 %v2699_v2  ;;  %2773 = vmatpush.bf16.msra.mxu1 %v2699_v2  ;;  %v2688_v26 = vld [vmem:[%s3169_s7 + $0x50] sm:$0xff]  ;;  %v3190_v28 = vld [vmem:[#allocation7] ss:$0 sm:$0xff]  ;;  %v2689_v29 = vld [vmem:[%s3169_s7 + $0x58] sm:$0xff]  ;;  %p2982_p8 = pneg %p2981_p4 }
  0x3b   : > { %2774 = vmatpush.bf16.msra.mxu2 %v2699_v2  ;;  %2775 = vmatpush.bf16.msra.mxu3 %v2699_v2  ;;  %v2690_v37 = vld [vmem:[%s3169_s7 + $0x60] sm:$0xff]  ;;  %v2691_v45 = vld [vmem:[%s3169_s7 + $0x68] sm:$0xff]  ;;  %v2717_v53 = vld [vmem:[#allocation5 + $0xb8] sm:$0xff] }
  0x3c   : > { %v2692_v55 = vld [vmem:[%s3169_s7 + $0x70] sm:$0xff]  ;;  %v2693_v1 = vld [vmem:[%s3169_s7 + $0x78] sm:$0xff]  ;;  %v2715_v2 = vld [vmem:[#allocation5 + $0xa8] sm:$0xff]  ;;  %p2987_p10 = pnand %p2986_p2, %p2982_p8 }
  0x3d   : > { %v2716_v63 = vld [vmem:[#allocation5 + $0xb0] sm:$0xff] }
  0x3e   : > { %425 = vmatpush.bf16.msra.mxu0 %v2698_v3  ;;  %2776 = vmatpush.bf16.msra.mxu1 %v2698_v3 }
  0x3f   : > { %2777 = vmatpush.bf16.msra.mxu2 %v2698_v3  ;;  %2778 = vmatpush.bf16.msra.mxu3 %v2698_v3 }
  0x42   : > { %426 = vmatpush.bf16.msra.mxu0 %v2697_v4  ;;  %2779 = vmatpush.bf16.msra.mxu1 %v2697_v4 }
  0x43   : > { %2780 = vmatpush.bf16.msra.mxu2 %v2697_v4  ;;  %2781 = vmatpush.bf16.msra.mxu3 %v2697_v4 }
  0x46   : > { %427 = vmatpush.bf16.msra.mxu0 %v2696_v5  ;;  %2782 = vmatpush.bf16.msra.mxu1 %v2696_v5 }
  0x47   : > { %2783 = vmatpush.bf16.msra.mxu2 %v2696_v5  ;;  %2784 = vmatpush.bf16.msra.mxu3 %v2696_v5 }
  0x4a   : > { %428 = vmatpush.bf16.msra.mxu0 %v2695_v6  ;;  %2785 = vmatpush.bf16.msra.mxu1 %v2695_v6 }
  0x4b   : > { %2786 = vmatpush.bf16.msra.mxu2 %v2695_v6  ;;  %2787 = vmatpush.bf16.msra.mxu3 %v2695_v6 }
  0x4e   : > { %429 = vmatpush.bf16.msra.mxu0 %v2694_v7  ;;  %2788 = vmatpush.bf16.msra.mxu1 %v2694_v7 }
  0x4f   : > { %2789 = vmatpush.bf16.msra.mxu2 %v2694_v7  ;;  %2790 = vmatpush.bf16.msra.mxu3 %v2694_v7 }
  0x51   : > { %430 = vmatmul.bf16.vlgmr.msra.gmra.mxu0 %v2678_v8  ;;  %450 = vmatmul.bf16.vlgmr.msra.gmra.mxu1 %v2682_v10  ;;  %v2713_v10 = vld [vmem:[#allocation5 + $0x98] sm:$0xff] }
  0x52   : > { %629 = vmatpush.bf16.msrb.mxu1 %v2709_v11  ;;  %470 = vmatmul.bf16.vlgmr.msra.gmra.mxu2 %v2686_v18  ;;  %v2712_v18 = vld [vmem:[#allocation5 + $0x90] sm:$0xff] }
  0x53   : > { %490 = vmatmul.bf16.vlgmr.msra.gmra.mxu3 %v2690_v37  ;;  %836 = vmatpush.bf16.msrb.mxu2 %v2717_v53 }
  0x56   : > { %630 = vmatpush.bf16.msrb.mxu1 %v2708_v12 }
  0x57   : > { %837 = vmatpush.bf16.msrb.mxu2 %v2716_v63 }
  0x5a   : > { %631 = vmatpush.bf16.msrb.mxu1 %v2707_v13 }
  0x5b   : > { %838 = vmatpush.bf16.msrb.mxu2 %v2715_v2 }
  0x5e   : > { %632 = vmatpush.bf16.msrb.mxu1 %v2706_v14 }
  0x61   : > { %435 = vmatmul.bf16.gmra.mxu0 %v2679_v9  ;;  %455 = vmatmul.bf16.gmra.mxu1 %v2683_v16  ;;  %v2714_v9 = vld [vmem:[#allocation5 + $0xa0] sm:$0xff] }
  0x62   : > { %633 = vmatpush.bf16.msrb.mxu1 %v2705_v17  ;;  %475 = vmatmul.bf16.gmra.mxu2 %v2687_v24 }
  0x63   : > { %495 = vmatmul.bf16.gmra.mxu3 %v2691_v45  ;;  %839 = vmatpush.bf16.msrb.mxu2 %v2714_v9 }
  0x66   : > { %634 = vmatpush.bf16.msrb.mxu1 %v2704_v19  ;;  %v2711_v19 = vld [vmem:[#allocation5 + $0x88] sm:$0xff] }
  0x67   : > { %840 = vmatpush.bf16.msrb.mxu2 %v2713_v10 }
  0x6a   : > { %635 = vmatpush.bf16.msrb.mxu1 %v2703_v20 }
  0x6b   : > { %841 = vmatpush.bf16.msrb.mxu2 %v2712_v18 }
  0x6e   : > { %636 = vmatpush.bf16.msrb.mxu1 %v2702_v25 }
  0x6f   : > { %842 = vmatpush.bf16.msrb.mxu2 %v2711_v19 }
  0x71   : > { %440 = vmatmul.bf16.gmra.mxu0 %v2680_v15  ;;  %460 = vmatmul.bf16.gmra.mxu1 %v2684_v22 }
  0x72   : > { %480 = vmatmul.bf16.gmra.mxu2 %v2688_v26 }
  0x73   : > { %500 = vmatmul.bf16.gmra.mxu3 %v2692_v55 }
  0x81   : > { %445 = vmatmul.bf16.gmra.mxu0 %v2681_v21  ;;  %465 = vmatmul.bf16.gmra.mxu1 %v2685_v23 }
  0x82   : > { %485 = vmatmul.bf16.gmra.mxu2 %v2689_v29 }
  0x83   : > { %505 = vmatmul.bf16.gmra.mxu3 %v2693_v1 }
  0xce   : > { %v431_v27 = vpop.f32.mrf.mxu0  ;;  %v451_v51 = vpop.f32.mrf.mxu1 }
  0xcf   : > { %v432_v30 = vadd.f32 %v3190_v28, %v431_v27  ;;  %v452_v3 = vadd.f32 %v3190_v28, %v451_v51  ;;  %v2710_v27 = vld [vmem:[#allocation5 + $0x80] sm:$0xff] }
  0xd0   : > { %843 = vmatpush.bf16.msrb.mxu2 %v2710_v27 }
  0xd1   : > { %v511_v33 = vmax.f32 %v432_v30, 0.0  ;;  %v519_v5 = vmax.f32 %v452_v3, 0.0 }
  0xd5   : > { %v471_v25 = vpop.f32.mrf.mxu2 }
  0xd6   : > { %v433_v31 = vpop.f32.mrf.mxu0  ;;  %v453_v56 = vpop.f32.mrf.mxu1  ;;  %v472_v37 = vadd.f32 %v3190_v28, %v471_v25 }
  0xd7   : > { %v434_v32 = vadd.f32 %v3190_v28, %v433_v31  ;;  %v454_v4 = vadd.f32 %v3190_v28, %v453_v56 }
  0xd9   : > { %v512_v34 = vmax.f32 %v434_v32, 0.0  ;;  %v520_v6 = vmax.f32 %v454_v4, 0.0 }
  0xdb   : > { %v562_v35 = vpack.c.bf16 %v512_v34, %v511_v33  ;;  %v566_v8 = vpack.c.bf16 %v520_v6, %v519_v5 }
  0xdd   : > { %637 = vmatmul.bf16.vlgmr.msrb.gmra.mxu1 %v562_v35  ;;  %v473_v32 = vpop.f32.mrf.mxu2 }
  0xde   : > { %v436_v36 = vpop.f32.mrf.mxu0  ;;  %v456_v0 = vpop.f32.mrf.mxu1 }
  0xdf   : > { %v437_v38 = vadd.f32 %v3190_v28, %v436_v36  ;;  %v457_v12 = vadd.f32 %v3190_v28, %v456_v0 }
  0xe1   : > { %v513_v41 = vmax.f32 %v437_v38, 0.0  ;;  %v521_v14 = vmax.f32 %v457_v12, 0.0  ;;  %v474_v38 = vadd.f32 %v3190_v28, %v473_v32 }
  0xe5   : > { %v476_v36 = vpop.f32.mrf.mxu2 }
  0xe6   : > { %v438_v39 = vpop.f32.mrf.mxu0  ;;  %v458_v7 = vpop.f32.mrf.mxu1 }
  0xe7   : > { %v439_v40 = vadd.f32 %v3190_v28, %v438_v39  ;;  %v459_v13 = vadd.f32 %v3190_v28, %v458_v7  ;;  %v527_v39 = vmax.f32 %v472_v37, 0.0  ;;  %v491_v7 = vpop.f32.mrf.mxu3 }
  0xe9   : > { %v514_v42 = vmax.f32 %v439_v40, 0.0  ;;  %v522_v15 = vmax.f32 %v459_v13, 0.0  ;;  %v528_v40 = vmax.f32 %v474_v38, 0.0  ;;  %v2725_v38 = vld [vmem:[#allocation5 + $0xf8] sm:$0xff] }
  0xea   : > { %1043 = vmatpush.bf16.msrb.mxu3 %v2725_v38  ;;  %v3249_v38 = vld [vmem:[#allocation7 + $0x2] ss:$0 sm:$0xff] }
  0xeb   : > { %v563_v43 = vpack.c.bf16 %v514_v42, %v513_v41  ;;  %v567_v16 = vpack.c.bf16 %v522_v15, %v521_v14 }
  0xed   : > { %642 = vmatmul.bf16.gmra.mxu1 %v563_v43  ;;  %v478_v41 = vpop.f32.mrf.mxu2  ;;  %v570_v43 = vpack.c.bf16 %v528_v40, %v527_v39 }
  0xee   : > { %v441_v44 = vpop.f32.mrf.mxu0  ;;  %v461_v11 = vpop.f32.mrf.mxu1 }
  0xef   : > { %v442_v46 = vadd.f32 %v3190_v28, %v441_v44  ;;  %v462_v20 = vadd.f32 %v3190_v28, %v461_v11  ;;  %v3215_v44 = vld [vmem:[#allocation7 + $0x1] ss:$0 sm:$0xff]  ;;  %v493_v15 = vpop.f32.mrf.mxu3 }
  0xf0   : > { %v494_v27 = vadd.f32 %v3190_v28, %v493_v15  ;;  %v2720_v15 = vld [vmem:[#allocation5 + $0xd0] sm:$0xff] }
  0xf1   : > { %v515_v49 = vmax.f32 %v442_v46, 0.0  ;;  %v523_v23 = vmax.f32 %v462_v20, 0.0 }
  0xf6   : > { %v443_v47 = vpop.f32.mrf.mxu0  ;;  %v463_v17 = vpop.f32.mrf.mxu1 }
  0xf7   : > { %v444_v48 = vadd.f32 %v3190_v28, %v443_v47  ;;  %v464_v21 = vadd.f32 %v3190_v28, %v463_v17  ;;  %v481_v47 = vpop.f32.mrf.mxu2 }
  0xf9   : > { %v516_v50 = vmax.f32 %v444_v48, 0.0  ;;  %v524_v24 = vmax.f32 %v464_v21, 0.0  ;;  %v477_v48 = vadd.f32 %v3190_v28, %v476_v36 }
  0xfb   : > { %v564_v52 = vpack.c.bf16 %v516_v50, %v515_v49  ;;  %v568_v26 = vpack.c.bf16 %v524_v24, %v523_v23  ;;  %v479_v49 = vadd.f32 %v3190_v28, %v478_v41  ;;  %v529_v53 = vmax.f32 %v477_v48, 0.0  ;;  %v496_v23 = vpop.f32.mrf.mxu3  ;;  %v2724_v48 = vld [vmem:[#allocation5 + $0xf0] sm:$0xff] }
  0xfc   : > { %1044 = vmatpush.bf16.msrb.mxu3 %v2724_v48 }
  0xfd   : > { %647 = vmatmul.bf16.gmra.mxu1 %v564_v52 }
  0xfe   : > { %v446_v54 = vpop.f32.mrf.mxu0  ;;  %v466_v22 = vpop.f32.mrf.mxu1 }
  0xff   : > { %v447_v57 = vadd.f32 %v3190_v28, %v446_v54  ;;  %v467_v30 = vadd.f32 %v3190_v28, %v466_v22  ;;  %v530_v54 = vmax.f32 %v479_v49, 0.0 }
 0x101   : > { %v517_v60 = vmax.f32 %v447_v57, 0.0  ;;  %v525_v33 = vmax.f32 %v467_v30, 0.0  ;;  %v571_v57 = vpack.c.bf16 %v530_v54, %v529_v53 }
 0x106   : > { %v448_v58 = vpop.f32.mrf.mxu0  ;;  %v468_v29 = vpop.f32.mrf.mxu1 }
 0x107   : > { %v449_v59 = vadd.f32 %v3190_v28, %v448_v58  ;;  %v469_v31 = vadd.f32 %v3190_v28, %v468_v29  ;;  %v483_v58 = vpop.f32.mrf.mxu2 }
 0x109   : > { %v518_v61 = vmax.f32 %v449_v59, 0.0  ;;  %v526_v34 = vmax.f32 %v469_v31, 0.0 }
 0x10b   : > { %v565_v62 = vpack.c.bf16 %v518_v61, %v517_v60  ;;  %v569_v35 = vpack.c.bf16 %v526_v34, %v525_v33  ;;  %v482_v61 = vadd.f32 %v3190_v28, %v481_v47  ;;  %v536_v33 = vmax.f32 %v494_v27, 0.0 }
 0x10d   : > { %652 = vmatmul.bf16.gmra.mxu1 %v565_v62  ;;  %v484_v62 = vadd.f32 %v3190_v28, %v483_v58  ;;  %v531_v3 = vmax.f32 %v482_v61, 0.0 }
 0x10f   : > { %v486_v2 = vpop.f32.mrf.mxu2  ;;  %v532_v4 = vmax.f32 %v484_v62, 0.0 }
 0x110   : > { %v487_v12 = vadd.f32 %v3190_v28, %v486_v2 }
 0x112   : > { %v533_v18 = vmax.f32 %v487_v12, 0.0 }
 0x117   : > { %v488_v9 = vpop.f32.mrf.mxu2 }
 0x118   : > { %v489_v13 = vadd.f32 %v3190_v28, %v488_v9 }
 0x11a   : > { %v534_v19 = vmax.f32 %v489_v13, 0.0 }
 0x11c   : > { %v573_v22 = vpack.c.bf16 %v534_v19, %v533_v18 }
 0x11d   : > { %657 = vmatmul.bf16.gmra.mxu1 %v566_v8  ;;  %v572_v8 = vpack.c.bf16 %v532_v4, %v531_v3 }
 0x12d   : > { %662 = vmatmul.bf16.gmra.mxu1 %v567_v16 }
 0x13d   : > { %667 = vmatmul.bf16.gmra.mxu1 %v568_v26  ;;  %v492_v26 = vadd.f32 %v3190_v28, %v491_v7 }
 0x13f   : > { %v535_v32 = vmax.f32 %v492_v26, 0.0  ;;  %v2718_v26 = vld [vmem:[#allocation5 + $0xc0] sm:$0xff] }
 0x141   : > { %v574_v37 = vpack.c.bf16 %v536_v33, %v535_v32 }
 0x14d   : > { %672 = vmatmul.bf16.gmra.mxu1 %v569_v35  ;;  %v498_v35 = vpop.f32.mrf.mxu3 }
 0x155   : > { %v501_v41 = vpop.f32.mrf.mxu3 }
 0x156   : > { %v502_v58 = vadd.f32 %v3190_v28, %v501_v41 }
 0x15a   : > { %v638_v42 = vpop.f32.mrf.mxu1 }
 0x15b   : > { %v639_v45 = vadd.f32 %v3215_v44, %v638_v42  ;;  %v497_v42 = vadd.f32 %v3190_v28, %v496_v23 }
 0x15d   : > { %677 = vmatmul.bf16.gmra.mxu1 %v570_v43  ;;  %v718_v51 = vmax.f32 %v639_v45, 0.0  ;;  %v499_v43 = vadd.f32 %v3190_v28, %v498_v35  ;;  %v537_v49 = vmax.f32 %v497_v42, 0.0  ;;  %v503_v54 = vpop.f32.mrf.mxu3 }
 0x162   : > { %v640_v46 = vpop.f32.mrf.mxu1 }
 0x163   : > { %v641_v50 = vadd.f32 %v3215_v44, %v640_v46 }
 0x165   : > { %v719_v52 = vmax.f32 %v641_v50, 0.0  ;;  %v538_v50 = vmax.f32 %v499_v43, 0.0 }
 0x167   : > { %v769_v55 = vpack.c.bf16 %v719_v52, %v718_v51  ;;  %v575_v53 = vpack.c.bf16 %v538_v50, %v537_v49 }
 0x169   : > { %844 = vmatmul.bf16.vlgmr.msrb.gmra.mxu2 %v769_v55  ;;  %v2723_v55 = vld [vmem:[#allocation5 + $0xe8] sm:$0xff] }
 0x16a   : > { %v643_v56 = vpop.f32.mrf.mxu1  ;;  %1045 = vmatpush.bf16.msrb.mxu3 %v2723_v55 }
 0x16b   : > { %v644_v59 = vadd.f32 %v3215_v44, %v643_v56 }
 0x16d   : > { %682 = vmatmul.bf16.gmra.mxu1 %v571_v57  ;;  %v720_v0 = vmax.f32 %v644_v59, 0.0  ;;  %v504_v59 = vadd.f32 %v3190_v28, %v503_v54 }
 0x16f   : > { %v540_v2 = vmax.f32 %v504_v59, 0.0 }
 0x172   : > { %v645_v60 = vpop.f32.mrf.mxu1 }
 0x173   : > { %v646_v63 = vadd.f32 %v3215_v44, %v645_v60 }
 0x175   : > { %v721_v1 = vmax.f32 %v646_v63, 0.0  ;;  %v2722_v63 = vld [vmem:[#allocation5 + $0xe0] sm:$0xff] }
 0x176   : > { %1046 = vmatpush.bf16.msrb.mxu3 %v2722_v63 }
 0x177   : > { %v770_v5 = vpack.c.bf16 %v721_v1, %v720_v0  ;;  %v506_v0 = vpop.f32.mrf.mxu3  ;;  %v539_v1 = vmax.f32 %v502_v58, 0.0 }
 0x179   : > { %849 = vmatmul.bf16.gmra.mxu2 %v770_v5  ;;  %v576_v5 = vpack.c.bf16 %v540_v2, %v539_v1 }
 0x17a   : > { %v648_v6 = vpop.f32.mrf.mxu1 }
 0x17b   : > { %v649_v10 = vadd.f32 %v3215_v44, %v648_v6  ;;  %v2721_v6 = vld [vmem:[#allocation5 + $0xd8] sm:$0xff] }
 0x17c   : > { %1047 = vmatpush.bf16.msrb.mxu3 %v2721_v6 }
 0x17d   : > { %687 = vmatmul.bf16.gmra.mxu1 %v572_v8  ;;  %v722_v16 = vmax.f32 %v649_v10, 0.0  ;;  %v507_v10 = vadd.f32 %v3190_v28, %v506_v0 }
 0x17f   : > { %v508_v7 = vpop.f32.mrf.mxu3 }
 0x180   : > { %1048 = vmatpush.bf16.msrb.mxu3 %v2720_v15 }
 0x182   : > { %v650_v11 = vpop.f32.mrf.mxu1 }
 0x183   : > { %v651_v14 = vadd.f32 %v3215_v44, %v650_v11  ;;  %v509_v11 = vadd.f32 %v3190_v28, %v508_v7 }
 0x185   : > { %v723_v17 = vmax.f32 %v651_v14, 0.0 }
 0x187   : > { %v771_v20 = vpack.c.bf16 %v723_v17, %v722_v16  ;;  %v541_v16 = vmax.f32 %v507_v10, 0.0  ;;  %v542_v17 = vmax.f32 %v509_v11, 0.0 }
 0x189   : > { %854 = vmatmul.bf16.gmra.mxu2 %v771_v20  ;;  %v577_v20 = vpack.c.bf16 %v542_v17, %v541_v16  ;;  %v2740_v17 = vld [vmem:[#allocation5 + $0x170] sm:$0xff] }
 0x18a   : > { %v653_v21 = vpop.f32.mrf.mxu1 }
 0x18b   : > { %v654_v24 = vadd.f32 %v3215_v44, %v653_v21  ;;  %v2719_v21 = vld [vmem:[#allocation5 + $0xc8] sm:$0xff] }
 0x18c   : > { %1049 = vmatpush.bf16.msrb.mxu3 %v2719_v21 }
 0x18d   : > { %692 = vmatmul.bf16.gmra.mxu1 %v573_v22  ;;  %v724_v30 = vmax.f32 %v654_v24, 0.0 }
 0x190   : > { %1050 = vmatpush.bf16.msrb.mxu3 %v2718_v26 }
 0x192   : > { %v655_v25 = vpop.f32.mrf.mxu1 }
 0x193   : > { %v656_v29 = vadd.f32 %v3215_v44, %v655_v25 }
 0x195   : > { %v725_v31 = vmax.f32 %v656_v29, 0.0 }
 0x197   : > { %v772_v34 = vpack.c.bf16 %v725_v31, %v724_v30 }
 0x199   : > { %859 = vmatmul.bf16.gmra.mxu2 %v772_v34 }
 0x19a   : > { %v658_v36 = vpop.f32.mrf.mxu1 }
 0x19b   : > { %v659_v39 = vadd.f32 %v3215_v44, %v658_v36 }
 0x19d   : > { %697 = vmatmul.bf16.gmra.mxu1 %v574_v37  ;;  %v726_v46 = vmax.f32 %v659_v39, 0.0 }
 0x1a2   : > { %v660_v40 = vpop.f32.mrf.mxu1 }
 0x1a3   : > { %v661_v45 = vadd.f32 %v3215_v44, %v660_v40 }
 0x1a5   : > { %v727_v47 = vmax.f32 %v661_v45, 0.0 }
 0x1a7   : > { %v773_v51 = vpack.c.bf16 %v727_v47, %v726_v46 }
 0x1a9   : > { %864 = vmatmul.bf16.gmra.mxu2 %v773_v51 }
 0x1aa   : > { %v663_v52 = vpop.f32.mrf.mxu1 }
 0x1ab   : > { %v664_v56 = vadd.f32 %v3215_v44, %v663_v52  ;;  %v2741_v52 = vld [vmem:[#allocation5 + $0x178] sm:$0xff] }
 0x1ac   : > { %1457 = vmatpush.bf16.msra.mxu1 %v2741_v52 }
 0x1ad   : > { %702 = vmatmul.bf16.gmra.mxu1 %v575_v53  ;;  %v728_v61 = vmax.f32 %v664_v56, 0.0 }
 0x1b0   : > { %1458 = vmatpush.bf16.msra.mxu1 %v2740_v17  ;;  %v2728_v17 = vld [vmem:[#allocation5 + $0x110] sm:$0xff] }
 0x1b2   : > { %v665_v57 = vpop.f32.mrf.mxu1 }
 0x1b3   : > { %v666_v60 = vadd.f32 %v3215_v44, %v665_v57 }
 0x1b5   : > { %v729_v62 = vmax.f32 %v666_v60, 0.0 }
 0x1b7   : > { %v774_v3 = vpack.c.bf16 %v729_v62, %v728_v61 }
 0x1b9   : > { %869 = vmatmul.bf16.gmra.mxu2 %v774_v3 }
 0x1ba   : > { %v668_v4 = vpop.f32.mrf.mxu1 }
 0x1bb   : > { %v669_v8 = vadd.f32 %v3215_v44, %v668_v4 }
 0x1bd   : > { %707 = vmatmul.bf16.gmra.mxu1 %v576_v5  ;;  %v730_v13 = vmax.f32 %v669_v8, 0.0 }
 0x1c2   : > { %v670_v9 = vpop.f32.mrf.mxu1 }
 0x1c3   : > { %v671_v12 = vadd.f32 %v3215_v44, %v670_v9 }
 0x1c5   : > { %v731_v14 = vmax.f32 %v671_v12, 0.0 }
 0x1c7   : > { %v775_v18 = vpack.c.bf16 %v731_v14, %v730_v13 }
 0x1c9   : > { %874 = vmatmul.bf16.gmra.mxu2 %v775_v18 }
 0x1ca   : > { %v673_v19 = vpop.f32.mrf.mxu1 }
 0x1cb   : > { %v674_v22 = vadd.f32 %v3215_v44, %v673_v19 }
 0x1cd   : > { %712 = vmatmul.bf16.gmra.mxu1 %v577_v20  ;;  %v732_v24 = vmax.f32 %v674_v22, 0.0 }
 0x1d2   : > { %v675_v23 = vpop.f32.mrf.mxu1 }
 0x1d3   : > { %v676_v28 = vadd.f32 %v3215_v44, %v675_v23 }
 0x1d5   : > { %v733_v25 = vmax.f32 %v676_v28, 0.0 }
 0x1d7   : > { %v776_v27 = vpack.c.bf16 %v733_v25, %v732_v24 }
 0x1d9   : > { %879 = vmatmul.bf16.gmra.mxu2 %v776_v27 }
 0x1da   : > { %v678_v29 = vpop.f32.mrf.mxu1 }
 0x1db   : > { %v679_v30 = vadd.f32 %v3215_v44, %v678_v29 }
 0x1dd   : > { %v734_v33 = vmax.f32 %v679_v30, 0.0 }
 0x1e2   : > { %v680_v31 = vpop.f32.mrf.mxu1 }
 0x1e3   : > { %v681_v32 = vadd.f32 %v3215_v44, %v680_v31 }
 0x1e5   : > { %v735_v34 = vmax.f32 %v681_v32, 0.0 }
 0x1e7   : > { %v777_v35 = vpack.c.bf16 %v735_v34, %v734_v33  ;;  %v2733_v34 = vld [vmem:[#allocation5 + $0x138] sm:$0xff] }
 0x1e8   : > { %1250 = vmatpush.bf16.msrb.mxu0 %v2733_v34 }
 0x1e9   : > { %884 = vmatmul.bf16.gmra.mxu2 %v777_v35 }
 0x1ea   : > { %v683_v36 = vpop.f32.mrf.mxu1 }
 0x1eb   : > { %v684_v39 = vadd.f32 %v3215_v44, %v683_v36 }
 0x1ec   : > { %v845_v37 = vpop.f32.mrf.mxu2 }
 0x1ed   : > { %v846_v41 = vadd.f32 %v3249_v38, %v845_v37  ;;  %v736_v45 = vmax.f32 %v684_v39, 0.0 }
 0x1ef   : > { %v925_v48 = vmax.f32 %v846_v41, 0.0 }
 0x1f2   : > { %v685_v40 = vpop.f32.mrf.mxu1 }
 0x1f3   : > { %v686_v42 = vadd.f32 %v3215_v44, %v685_v40 }
 0x1f4   : > { %v847_v43 = vpop.f32.mrf.mxu2 }
 0x1f5   : > { %v737_v46 = vmax.f32 %v686_v42, 0.0  ;;  %v848_v47 = vadd.f32 %v3249_v38, %v847_v43 }
 0x1f7   : > { %v926_v49 = vmax.f32 %v848_v47, 0.0  ;;  %v778_v50 = vpack.c.bf16 %v737_v46, %v736_v45 }
 0x1f9   : > { %889 = vmatmul.bf16.gmra.mxu2 %v778_v50  ;;  %v976_v51 = vpack.c.bf16 %v926_v49, %v925_v48  ;;  %v2732_v48 = vld [vmem:[#allocation5 + $0x130] sm:$0xff]  ;;  %v2739_v50 = vld [vmem:[#allocation5 + $0x168] sm:$0xff] }
 0x1fa   : > { %v688_v53 = vpop.f32.mrf.mxu1  ;;  %1251 = vmatpush.bf16.msrb.mxu0 %v2732_v48  ;;  %1459 = vmatpush.bf16.msra.mxu1 %v2739_v50 }
 0x1fb   : > { %1051 = vmatmul.bf16.vlgmr.msrb.gmra.mxu3 %v976_v51  ;;  %v689_v55 = vadd.f32 %v3215_v44, %v688_v53  ;;  %v2731_v53 = vld [vmem:[#allocation5 + $0x128] sm:$0xff] }
 0x1fc   : > { %v850_v54 = vpop.f32.mrf.mxu2 }
 0x1fd   : > { %v851_v57 = vadd.f32 %v3249_v38, %v850_v54  ;;  %v738_v60 = vmax.f32 %v689_v55, 0.0 }
 0x1fe   : > { %1252 = vmatpush.bf16.msrb.mxu0 %v2731_v53 }
 0x1ff   : > { %v927_v63 = vmax.f32 %v851_v57, 0.0 }
 0x202   : > { %v690_v56 = vpop.f32.mrf.mxu1 }
 0x203   : > { %v691_v58 = vadd.f32 %v3215_v44, %v690_v56 }
 0x204   : > { %v852_v59 = vpop.f32.mrf.mxu2 }
 0x205   : > { %v739_v61 = vmax.f32 %v691_v58, 0.0  ;;  %v853_v62 = vadd.f32 %v3249_v38, %v852_v59 }
 0x207   : > { %v928_v0 = vmax.f32 %v853_v62, 0.0  ;;  %v779_v1 = vpack.c.bf16 %v739_v61, %v738_v60 }
 0x209   : > { %894 = vmatmul.bf16.gmra.mxu2 %v779_v1  ;;  %v977_v2 = vpack.c.bf16 %v928_v0, %v927_v63  ;;  %v2730_v1 = vld [vmem:[#allocation5 + $0x120] sm:$0xff] }
 0x20a   : > { %v693_v3 = vpop.f32.mrf.mxu1  ;;  %1253 = vmatpush.bf16.msrb.mxu0 %v2730_v1 }
 0x20b   : > { %1056 = vmatmul.bf16.gmra.mxu3 %v977_v2  ;;  %v694_v5 = vadd.f32 %v3215_v44, %v693_v3 }
 0x20c   : > { %v855_v4 = vpop.f32.mrf.mxu2 }
 0x20d   : > { %v856_v7 = vadd.f32 %v3249_v38, %v855_v4  ;;  %v740_v10 = vmax.f32 %v694_v5, 0.0  ;;  %v2729_v5 = vld [vmem:[#allocation5 + $0x118] sm:$0xff] }
 0x20e   : > { %1254 = vmatpush.bf16.msrb.mxu0 %v2729_v5 }
 0x20f   : > { %v929_v13 = vmax.f32 %v856_v7, 0.0 }
 0x212   : > { %v695_v6 = vpop.f32.mrf.mxu1  ;;  %1255 = vmatpush.bf16.msrb.mxu0 %v2728_v17 }
 0x213   : > { %v696_v8 = vadd.f32 %v3215_v44, %v695_v6 }
 0x214   : > { %v857_v9 = vpop.f32.mrf.mxu2 }
 0x215   : > { %v741_v11 = vmax.f32 %v696_v8, 0.0  ;;  %v858_v12 = vadd.f32 %v3249_v38, %v857_v9 }
 0x217   : > { %v930_v14 = vmax.f32 %v858_v12, 0.0  ;;  %v780_v15 = vpack.c.bf16 %v741_v11, %v740_v10 }
 0x219   : > { %899 = vmatmul.bf16.gmra.mxu2 %v780_v15  ;;  %v978_v16 = vpack.c.bf16 %v930_v14, %v929_v13 }
 0x21a   : > { %v698_v18 = vpop.f32.mrf.mxu1 }
 0x21b   : > { %1061 = vmatmul.bf16.gmra.mxu3 %v978_v16  ;;  %v699_v20 = vadd.f32 %v3215_v44, %v698_v18  ;;  %v2738_v18 = vld [vmem:[#allocation5 + $0x160] sm:$0xff] }
 0x21c   : > { %v860_v19 = vpop.f32.mrf.mxu2  ;;  %1460 = vmatpush.bf16.msra.mxu1 %v2738_v18 }
 0x21d   : > { %v861_v22 = vadd.f32 %v3249_v38, %v860_v19  ;;  %v742_v24 = vmax.f32 %v699_v20, 0.0 }
 0x21f   : > { %v931_v27 = vmax.f32 %v861_v22, 0.0 }
 0x222   : > { %v700_v21 = vpop.f32.mrf.mxu1 }
 0x223   : > { %v701_v23 = vadd.f32 %v3215_v44, %v700_v21  ;;  %v2727_v21 = vld [vmem:[#allocation5 + $0x108] sm:$0xff] }
 0x224   : > { %v862_v28 = vpop.f32.mrf.mxu2  ;;  %1256 = vmatpush.bf16.msrb.mxu0 %v2727_v21 }
 0x225   : > { %v743_v25 = vmax.f32 %v701_v23, 0.0  ;;  %v863_v26 = vadd.f32 %v3249_v38, %v862_v28 }
 0x227   : > { %v932_v29 = vmax.f32 %v863_v26, 0.0  ;;  %v781_v30 = vpack.c.bf16 %v743_v25, %v742_v24  ;;  %v2726_v25 = vld [vmem:[#allocation5 + $0x100] sm:$0xff] }
 0x228   : > { %1257 = vmatpush.bf16.msrb.mxu0 %v2726_v25 }
 0x229   : > { %904 = vmatmul.bf16.gmra.mxu2 %v781_v30  ;;  %v979_v31 = vpack.c.bf16 %v932_v29, %v931_v27 }
 0x22a   : > { %v703_v32 = vpop.f32.mrf.mxu1 }
 0x22b   : > { %1066 = vmatmul.bf16.gmra.mxu3 %v979_v31  ;;  %v704_v35 = vadd.f32 %v3215_v44, %v703_v32 }
 0x22c   : > { %v865_v33 = vpop.f32.mrf.mxu2 }
 0x22d   : > { %v866_v37 = vadd.f32 %v3249_v38, %v865_v33  ;;  %v744_v41 = vmax.f32 %v704_v35, 0.0  ;;  %v2737_v35 = vld [vmem:[#allocation5 + $0x158] sm:$0xff] }
 0x22e   : > { %1461 = vmatpush.bf16.msra.mxu1 %v2737_v35 }
 0x22f   : > { %v933_v45 = vmax.f32 %v866_v37, 0.0 }
 0x232   : > { %v705_v36 = vpop.f32.mrf.mxu1 }
 0x233   : > { %v706_v39 = vadd.f32 %v3215_v44, %v705_v36 }
 0x234   : > { %v867_v40 = vpop.f32.mrf.mxu2 }
 0x235   : > { %v745_v42 = vmax.f32 %v706_v39, 0.0  ;;  %v868_v43 = vadd.f32 %v3249_v38, %v867_v40  ;;  %v3283_v39 = vld [vmem:[#allocation7 + $0x3] ss:$0 sm:$0xff] }
 0x237   : > { %v934_v46 = vmax.f32 %v868_v43, 0.0  ;;  %v782_v47 = vpack.c.bf16 %v745_v42, %v744_v41 }
 0x239   : > { %909 = vmatmul.bf16.gmra.mxu2 %v782_v47  ;;  %v980_v49 = vpack.c.bf16 %v934_v46, %v933_v45 }
 0x23a   : > { %v708_v51 = vpop.f32.mrf.mxu1 }
 0x23b   : > { %1071 = vmatmul.bf16.gmra.mxu3 %v980_v49  ;;  %v709_v54 = vadd.f32 %v3215_v44, %v708_v51  ;;  %v2749_v49 = vld [vmem:[#allocation5 + $0x1b8] sm:$0xff] }
 0x23c   : > { %v870_v52 = vpop.f32.mrf.mxu2  ;;  %1664 = vmatpush.bf16.msra.mxu2 %v2749_v49 }
 0x23d   : > { %v871_v56 = vadd.f32 %v3249_v38, %v870_v52  ;;  %v746_v59 = vmax.f32 %v709_v54, 0.0 }
 0x23f   : > { %v935_v62 = vmax.f32 %v871_v56, 0.0 }
 0x242   : > { %v710_v55 = vpop.f32.mrf.mxu1 }
 0x243   : > { %v711_v57 = vadd.f32 %v3215_v44, %v710_v55 }
 0x244   : > { %v872_v58 = vpop.f32.mrf.mxu2 }
 0x245   : > { %v747_v60 = vmax.f32 %v711_v57, 0.0  ;;  %v873_v61 = vadd.f32 %v3249_v38, %v872_v58 }
 0x247   : > { %v936_v63 = vmax.f32 %v873_v61, 0.0  ;;  %v783_v0 = vpack.c.bf16 %v747_v60, %v746_v59 }
 0x249   : > { %914 = vmatmul.bf16.gmra.mxu2 %v783_v0  ;;  %v981_v2 = vpack.c.bf16 %v936_v63, %v935_v62 }
 0x24a   : > { %v713_v3 = vpop.f32.mrf.mxu1 }
 0x24b   : > { %1076 = vmatmul.bf16.gmra.mxu3 %v981_v2  ;;  %v714_v6 = vadd.f32 %v3215_v44, %v713_v3  ;;  %v2736_v3 = vld [vmem:[#allocation5 + $0x150] sm:$0xff] }
 0x24c   : > { %v875_v4 = vpop.f32.mrf.mxu2  ;;  %1462 = vmatpush.bf16.msra.mxu1 %v2736_v3 }
 0x24d   : > { %v876_v8 = vadd.f32 %v3249_v38, %v875_v4  ;;  %v748_v11 = vmax.f32 %v714_v6, 0.0 }
 0x24f   : > { %v937_v14 = vmax.f32 %v876_v8, 0.0 }
 0x252   : > { %v715_v7 = vpop.f32.mrf.mxu1 }
 0x253   : > { %v716_v9 = vadd.f32 %v3215_v44, %v715_v7 }
 0x254   : > { %v877_v10 = vpop.f32.mrf.mxu2 }
 0x255   : > { %v749_v12 = vmax.f32 %v716_v9, 0.0  ;;  %v878_v13 = vadd.f32 %v3249_v38, %v877_v10 }
 0x257   : > { %v938_v15 = vmax.f32 %v878_v13, 0.0  ;;  %v784_v16 = vpack.c.bf16 %v749_v12, %v748_v11 }
 0x259   : > { %919 = vmatmul.bf16.gmra.mxu2 %v784_v16  ;;  %v982_v19 = vpack.c.bf16 %v938_v15, %v937_v14  ;;  %v2748_v15 = vld [vmem:[#allocation5 + $0x1b0] sm:$0xff] }
 0x25a   : > { %1665 = vmatpush.bf16.msra.mxu2 %v2748_v15 }
 0x25b   : > { %1081 = vmatmul.bf16.gmra.mxu3 %v982_v19 }
 0x25c   : > { %v880_v20 = vpop.f32.mrf.mxu2 }
 0x25d   : > { %v881_v44 = vadd.f32 %v3249_v38, %v880_v20 }
 0x25f   : > { %v939_v28 = vmax.f32 %v881_v44, 0.0 }
 0x264   : > { %v882_v22 = vpop.f32.mrf.mxu2 }
 0x265   : > { %v883_v23 = vadd.f32 %v3249_v38, %v882_v22 }
 0x267   : > { %v940_v24 = vmax.f32 %v883_v23, 0.0 }
 0x269   : > { %v983_v26 = vpack.c.bf16 %v940_v24, %v939_v28 }
 0x26b   : > { %1086 = vmatmul.bf16.gmra.mxu3 %v983_v26 }
 0x26c   : > { %v885_v27 = vpop.f32.mrf.mxu2 }
 0x26d   : > { %v886_v29 = vadd.f32 %v3249_v38, %v885_v27 }
 0x26f   : > { %v941_v32 = vmax.f32 %v886_v29, 0.0 }
 0x274   : > { %v887_v30 = vpop.f32.mrf.mxu2 }
 0x275   : > { %v888_v31 = vadd.f32 %v3249_v38, %v887_v30 }
 0x277   : > { %v942_v33 = vmax.f32 %v888_v31, 0.0 }
 0x279   : > { %v984_v34 = vpack.c.bf16 %v942_v33, %v941_v32  ;;  %v2735_v32 = vld [vmem:[#allocation5 + $0x148] sm:$0xff] }
 0x27a   : > { %1463 = vmatpush.bf16.msra.mxu1 %v2735_v32  ;;  %v3317_v32 = vld [vmem:[#allocation7 + $0x4] ss:$0 sm:$0xff] }
 0x27b   : > { %1091 = vmatmul.bf16.gmra.mxu3 %v984_v34 }
 0x27c   : > { %v890_v36 = vpop.f32.mrf.mxu2 }
 0x27d   : > { %v891_v40 = vadd.f32 %v3249_v38, %v890_v36 }
 0x27e   : > { %v1052_v37 = vpop.f32.mrf.mxu3 }
 0x27f   : > { %v1053_v42 = vadd.f32 %v3283_v39, %v1052_v37  ;;  %v943_v46 = vmax.f32 %v891_v40, 0.0 }
 0x281   : > { %v1132_v50 = vmax.f32 %v1053_v42, 0.0 }
 0x284   : > { %v892_v41 = vpop.f32.mrf.mxu2 }
 0x285   : > { %v893_v43 = vadd.f32 %v3249_v38, %v892_v41 }
 0x286   : > { %v1054_v45 = vpop.f32.mrf.mxu3 }
 0x287   : > { %v944_v47 = vmax.f32 %v893_v43, 0.0  ;;  %v1055_v48 = vadd.f32 %v3283_v39, %v1054_v45 }
 0x289   : > { %v1133_v51 = vmax.f32 %v1055_v48, 0.0  ;;  %v985_v52 = vpack.c.bf16 %v944_v47, %v943_v46  ;;  %v2747_v47 = vld [vmem:[#allocation5 + $0x1a8] sm:$0xff] }
 0x28a   : > { %1666 = vmatpush.bf16.msra.mxu2 %v2747_v47 }
 0x28b   : > { %1096 = vmatmul.bf16.gmra.mxu3 %v985_v52  ;;  %v1183_v53 = vpack.c.bf16 %v1133_v51, %v1132_v50 }
 0x28c   : > { %v895_v54 = vpop.f32.mrf.mxu2 }
 0x28d   : > { %1258 = vmatmul.bf16.vlgmr.msrb.gmra.mxu0 %v1183_v53  ;;  %v896_v56 = vadd.f32 %v3249_v38, %v895_v54 }
 0x28e   : > { %v1057_v55 = vpop.f32.mrf.mxu3 }
 0x28f   : > { %v1058_v58 = vadd.f32 %v3283_v39, %v1057_v55  ;;  %v945_v61 = vmax.f32 %v896_v56, 0.0 }
 0x291   : > { %v1134_v0 = vmax.f32 %v1058_v58, 0.0 }
 0x294   : > { %v897_v57 = vpop.f32.mrf.mxu2 }
 0x295   : > { %v898_v59 = vadd.f32 %v3249_v38, %v897_v57 }
 0x296   : > { %v1059_v60 = vpop.f32.mrf.mxu3 }
 0x297   : > { %v946_v62 = vmax.f32 %v898_v59, 0.0  ;;  %v1060_v63 = vadd.f32 %v3283_v39, %v1059_v60 }
 0x299   : > { %v1135_v1 = vmax.f32 %v1060_v63, 0.0  ;;  %v986_v2 = vpack.c.bf16 %v946_v62, %v945_v61 }
 0x29b   : > { %1101 = vmatmul.bf16.gmra.mxu3 %v986_v2  ;;  %v1184_v4 = vpack.c.bf16 %v1135_v1, %v1134_v0  ;;  %v2734_v1 = vld [vmem:[#allocation5 + $0x140] sm:$0xff] }
 0x29c   : > { %v900_v5 = vpop.f32.mrf.mxu2  ;;  %1464 = vmatpush.bf16.msra.mxu1 %v2734_v1 }
 0x29d   : > { %1263 = vmatmul.bf16.gmra.mxu0 %v1184_v4  ;;  %v901_v7 = vadd.f32 %v3249_v38, %v900_v5  ;;  %v2746_v5 = vld [vmem:[#allocation5 + $0x1a0] sm:$0xff] }
 0x29e   : > { %v1062_v6 = vpop.f32.mrf.mxu3  ;;  %1667 = vmatpush.bf16.msra.mxu2 %v2746_v5 }
 0x29f   : > { %v1063_v9 = vadd.f32 %v3283_v39, %v1062_v6  ;;  %v947_v12 = vmax.f32 %v901_v7, 0.0 }
 0x2a1   : > { %v1136_v16 = vmax.f32 %v1063_v9, 0.0 }
 0x2a4   : > { %v902_v8 = vpop.f32.mrf.mxu2 }
 0x2a5   : > { %v903_v10 = vadd.f32 %v3249_v38, %v902_v8 }
 0x2a6   : > { %v1064_v11 = vpop.f32.mrf.mxu3 }
 0x2a7   : > { %v948_v13 = vmax.f32 %v903_v10, 0.0  ;;  %v1065_v14 = vadd.f32 %v3283_v39, %v1064_v11 }
 0x2a9   : > { %v1137_v17 = vmax.f32 %v1065_v14, 0.0  ;;  %v987_v18 = vpack.c.bf16 %v948_v13, %v947_v12 }
 0x2ab   : > { %1106 = vmatmul.bf16.gmra.mxu3 %v987_v18  ;;  %v1185_v19 = vpack.c.bf16 %v1137_v17, %v1136_v16 }
 0x2ac   : > { %v905_v20 = vpop.f32.mrf.mxu2 }
 0x2ad   : > { %1268 = vmatmul.bf16.gmra.mxu0 %v1185_v19  ;;  %v906_v44 = vadd.f32 %v3249_v38, %v905_v20 }
 0x2ae   : > { %v1067_v21 = vpop.f32.mrf.mxu3 }
 0x2af   : > { %v1068_v23 = vadd.f32 %v3283_v39, %v1067_v21  ;;  %v949_v25 = vmax.f32 %v906_v44, 0.0 }
 0x2b1   : > { %v1138_v29 = vmax.f32 %v1068_v23, 0.0 }
 0x2b4   : > { %v907_v22 = vpop.f32.mrf.mxu2 }
 0x2b5   : > { %v908_v28 = vadd.f32 %v3249_v38, %v907_v22 }
 0x2b6   : > { %v1069_v24 = vpop.f32.mrf.mxu3 }
 0x2b7   : > { %v950_v26 = vmax.f32 %v908_v28, 0.0  ;;  %v1070_v27 = vadd.f32 %v3283_v39, %v1069_v24  ;;  %v2745_v24 = vld [vmem:[#allocation5 + $0x198] sm:$0xff] }
 0x2b8   : > { %1668 = vmatpush.bf16.msra.mxu2 %v2745_v24 }
 0x2b9   : > { %v1139_v30 = vmax.f32 %v1070_v27, 0.0  ;;  %v988_v31 = vpack.c.bf16 %v950_v26, %v949_v25 }
 0x2bb   : > { %1111 = vmatmul.bf16.gmra.mxu3 %v988_v31  ;;  %v1186_v33 = vpack.c.bf16 %v1139_v30, %v1138_v29 }
 0x2bc   : > { %v910_v34 = vpop.f32.mrf.mxu2 }
 0x2bd   : > { %1273 = vmatmul.bf16.gmra.mxu0 %v1186_v33  ;;  %v911_v36 = vadd.f32 %v3249_v38, %v910_v34 }
 0x2be   : > { %v1072_v35 = vpop.f32.mrf.mxu3 }
 0x2bf   : > { %v1073_v40 = vadd.f32 %v3283_v39, %v1072_v35  ;;  %v951_v43 = vmax.f32 %v911_v36, 0.0 }
 0x2c1   : > { %v1140_v48 = vmax.f32 %v1073_v40, 0.0 }
 0x2c4   : > { %v912_v37 = vpop.f32.mrf.mxu2 }
 0x2c5   : > { %v913_v41 = vadd.f32 %v3249_v38, %v912_v37 }
 0x2c6   : > { %v1074_v42 = vpop.f32.mrf.mxu3 }
 0x2c7   : > { %v952_v45 = vmax.f32 %v913_v41, 0.0  ;;  %v1075_v46 = vadd.f32 %v3283_v39, %v1074_v42 }
 0x2c9   : > { %v1141_v49 = vmax.f32 %v1075_v46, 0.0  ;;  %v989_v50 = vpack.c.bf16 %v952_v45, %v951_v43 }
 0x2cb   : > { %1116 = vmatmul.bf16.gmra.mxu3 %v989_v50  ;;  %v1187_v51 = vpack.c.bf16 %v1141_v49, %v1140_v48  ;;  %v2757_v48 = vld [vmem:[#allocation5 + $0x1f8] sm:$0xff] }
 0x2cc   : > { %v915_v52 = vpop.f32.mrf.mxu2  ;;  %1871 = vmatpush.bf16.msra.mxu3 %v2757_v48 }
 0x2cd   : > { %1278 = vmatmul.bf16.gmra.mxu0 %v1187_v51  ;;  %v916_v54 = vadd.f32 %v3249_v38, %v915_v52 }
 0x2ce   : > { %v1077_v53 = vpop.f32.mrf.mxu3 }
 0x2cf   : > { %v1078_v56 = vadd.f32 %v3283_v39, %v1077_v53  ;;  %v953_v59 = vmax.f32 %v916_v54, 0.0 }
 0x2d1   : > { %v1142_v62 = vmax.f32 %v1078_v56, 0.0 }
 0x2d4   : > { %v917_v55 = vpop.f32.mrf.mxu2 }
 0x2d5   : > { %v918_v57 = vadd.f32 %v3249_v38, %v917_v55 }
 0x2d6   : > { %v1079_v58 = vpop.f32.mrf.mxu3 }
 0x2d7   : > { %v954_v60 = vmax.f32 %v918_v57, 0.0  ;;  %v1080_v61 = vadd.f32 %v3283_v39, %v1079_v58  ;;  %v2744_v58 = vld [vmem:[#allocation5 + $0x190] sm:$0xff] }
 0x2d8   : > { %1669 = vmatpush.bf16.msra.mxu2 %v2744_v58 }
 0x2d9   : > { %v1143_v63 = vmax.f32 %v1080_v61, 0.0  ;;  %v990_v0 = vpack.c.bf16 %v954_v60, %v953_v59 }
 0x2db   : > { %1121 = vmatmul.bf16.gmra.mxu3 %v990_v0  ;;  %v1188_v2 = vpack.c.bf16 %v1143_v63, %v1142_v62 }
 0x2dc   : > { %v920_v3 = vpop.f32.mrf.mxu2 }
 0x2dd   : > { %1283 = vmatmul.bf16.gmra.mxu0 %v1188_v2  ;;  %v921_v6 = vadd.f32 %v3249_v38, %v920_v3 }
 0x2de   : > { %v1082_v4 = vpop.f32.mrf.mxu3 }
 0x2df   : > { %v1083_v8 = vadd.f32 %v3283_v39, %v1082_v4  ;;  %v955_v11 = vmax.f32 %v921_v6, 0.0 }
 0x2e1   : > { %v1144_v14 = vmax.f32 %v1083_v8, 0.0 }
 0x2e4   : > { %v922_v7 = vpop.f32.mrf.mxu2 }
 0x2e5   : > { %v923_v9 = vadd.f32 %v3249_v38, %v922_v7 }
 0x2e6   : > { %v1084_v10 = vpop.f32.mrf.mxu3 }
 0x2e7   : > { %v956_v12 = vmax.f32 %v923_v9, 0.0  ;;  %v1085_v13 = vadd.f32 %v3283_v39, %v1084_v10 }
 0x2e9   : > { %v1145_v15 = vmax.f32 %v1085_v13, 0.0  ;;  %v991_v16 = vpack.c.bf16 %v956_v12, %v955_v11 }
 0x2eb   : > { %1126 = vmatmul.bf16.gmra.mxu3 %v991_v16  ;;  %v1189_v17 = vpack.c.bf16 %v1145_v15, %v1144_v14  ;;  %v2756_v14 = vld [vmem:[#allocation5 + $0x1f0] sm:$0xff] }
 0x2ec   : > { %1872 = vmatpush.bf16.msra.mxu3 %v2756_v14 }
 0x2ed   : > { %1288 = vmatmul.bf16.gmra.mxu0 %v1189_v17 }
 0x2ee   : > { %v1087_v18 = vpop.f32.mrf.mxu3 }
 0x2ef   : > { %v1088_v19 = vadd.f32 %v3283_v39, %v1087_v18 }
 0x2f1   : > { %v1146_v44 = vmax.f32 %v1088_v19, 0.0 }
 0x2f6   : > { %v1089_v20 = vpop.f32.mrf.mxu3 }
 0x2f7   : > { %v1090_v21 = vadd.f32 %v3283_v39, %v1089_v20 }
 0x2f9   : > { %v1147_v22 = vmax.f32 %v1090_v21, 0.0 }
 0x2fb   : > { %v1190_v38 = vpack.c.bf16 %v1147_v22, %v1146_v44 }
 0x2fd   : > { %1293 = vmatmul.bf16.gmra.mxu0 %v1190_v38  ;;  %v2743_v38 = vld [vmem:[#allocation5 + $0x188] sm:$0xff] }
 0x2fe   : > { %v1092_v23 = vpop.f32.mrf.mxu3  ;;  %1670 = vmatpush.bf16.msra.mxu2 %v2743_v38 }
 0x2ff   : > { %v1093_v28 = vadd.f32 %v3283_v39, %v1092_v23 }
 0x301   : > { %v1148_v27 = vmax.f32 %v1093_v28, 0.0 }
 0x306   : > { %v1094_v25 = vpop.f32.mrf.mxu3 }
 0x307   : > { %v1095_v26 = vadd.f32 %v3283_v39, %v1094_v25 }
 0x309   : > { %v1149_v29 = vmax.f32 %v1095_v26, 0.0 }
 0x30a   : > { %v1259_v30 = vpop.f32.mrf.mxu0 }
 0x30b   : > { %v1191_v31 = vpack.c.bf16 %v1149_v29, %v1148_v27  ;;  %v1260_v34 = vadd.f32 %v3317_v32, %v1259_v30 }
 0x30d   : > { %1298 = vmatmul.bf16.gmra.mxu0 %v1191_v31  ;;  %v1339_v37 = vmax.f32 %v1260_v34, 0.0 }
 0x30e   : > { %v1097_v33 = vpop.f32.mrf.mxu3 }
 0x30f   : > { %v1098_v40 = vadd.f32 %v3283_v39, %v1097_v33 }
 0x311   : > { %v1150_v46 = vmax.f32 %v1098_v40, 0.0 }
 0x312   : > { %v1261_v35 = vpop.f32.mrf.mxu0 }
 0x313   : > { %v1262_v36 = vadd.f32 %v3317_v32, %v1261_v35 }
 0x315   : > { %v1340_v41 = vmax.f32 %v1262_v36, 0.0 }
 0x316   : > { %v1099_v42 = vpop.f32.mrf.mxu3 }
 0x317   : > { %v1390_v43 = vpack.c.bf16 %v1340_v41, %v1339_v37  ;;  %v1100_v45 = vadd.f32 %v3283_v39, %v1099_v42 }
 0x319   : > { %v1151_v47 = vmax.f32 %v1100_v45, 0.0  ;;  %1465 = vmatmul.bf16.vlgmr.msra.gmra.mxu1 %v1390_v43 }
 0x31a   : > { %v1264_v49 = vpop.f32.mrf.mxu0 }
 0x31b   : > { %v1192_v50 = vpack.c.bf16 %v1151_v47, %v1150_v46  ;;  %v1265_v52 = vadd.f32 %v3317_v32, %v1264_v49  ;;  %v2755_v46 = vld [vmem:[#allocation5 + $0x1e8] sm:$0xff] }
 0x31c   : > { %1873 = vmatpush.bf16.msra.mxu3 %v2755_v46  ;;  %v2765_v46 = vld [vmem:[#allocation5 + $0x238] sm:$0xff] }
 0x31d   : > { %1303 = vmatmul.bf16.gmra.mxu0 %v1192_v50  ;;  %v1341_v55 = vmax.f32 %v1265_v52, 0.0 }
 0x31e   : > { %v1102_v51 = vpop.f32.mrf.mxu3  ;;  %2078 = vmatpush.bf16.msra.mxu0 %v2765_v46 }
 0x31f   : > { %v1103_v56 = vadd.f32 %v3283_v39, %v1102_v51 }
 0x321   : > { %v1152_v62 = vmax.f32 %v1103_v56, 0.0  ;;  %v2742_v56 = vld [vmem:[#allocation5 + $0x180] sm:$0xff] }
 0x322   : > { %v1266_v53 = vpop.f32.mrf.mxu0  ;;  %1671 = vmatpush.bf16.msra.mxu2 %v2742_v56 }
 0x323   : > { %v1267_v54 = vadd.f32 %v3317_v32, %v1266_v53 }
 0x325   : > { %v1342_v57 = vmax.f32 %v1267_v54, 0.0 }
 0x326   : > { %v1104_v59 = vpop.f32.mrf.mxu3 }
 0x327   : > { %v1105_v60 = vadd.f32 %v3283_v39, %v1104_v59  ;;  %v1391_v61 = vpack.c.bf16 %v1342_v57, %v1341_v55 }
 0x329   : > { %v1153_v63 = vmax.f32 %v1105_v60, 0.0  ;;  %1470 = vmatmul.bf16.gmra.mxu1 %v1391_v61 }
 0x32a   : > { %v1269_v0 = vpop.f32.mrf.mxu0 }
 0x32b   : > { %v1193_v1 = vpack.c.bf16 %v1153_v63, %v1152_v62  ;;  %v1270_v3 = vadd.f32 %v3317_v32, %v1269_v0 }
 0x32d   : > { %1308 = vmatmul.bf16.gmra.mxu0 %v1193_v1  ;;  %v1343_v6 = vmax.f32 %v1270_v3, 0.0 }
 0x32e   : > { %v1107_v2 = vpop.f32.mrf.mxu3 }
 0x32f   : > { %v1108_v7 = vadd.f32 %v3283_v39, %v1107_v2 }
 0x331   : > { %v1154_v12 = vmax.f32 %v1108_v7, 0.0 }
 0x332   : > { %v1271_v4 = vpop.f32.mrf.mxu0 }
 0x333   : > { %v1272_v5 = vadd.f32 %v3317_v32, %v1271_v4 }
 0x335   : > { %v1344_v8 = vmax.f32 %v1272_v5, 0.0 }
 0x336   : > { %v1109_v9 = vpop.f32.mrf.mxu3 }
 0x337   : > { %v1110_v10 = vadd.f32 %v3283_v39, %v1109_v9  ;;  %v1392_v11 = vpack.c.bf16 %v1344_v8, %v1343_v6 }
 0x339   : > { %v1155_v13 = vmax.f32 %v1110_v10, 0.0  ;;  %1475 = vmatmul.bf16.gmra.mxu1 %v1392_v11 }
 0x33a   : > { %v1274_v15 = vpop.f32.mrf.mxu0 }
 0x33b   : > { %v1194_v16 = vpack.c.bf16 %v1155_v13, %v1154_v12  ;;  %v1275_v18 = vadd.f32 %v3317_v32, %v1274_v15  ;;  %v2754_v12 = vld [vmem:[#allocation5 + $0x1e0] sm:$0xff] }
 0x33c   : > { %1874 = vmatpush.bf16.msra.mxu3 %v2754_v12  ;;  %v2764_v12 = vld [vmem:[#allocation5 + $0x230] sm:$0xff] }
 0x33d   : > { %1313 = vmatmul.bf16.gmra.mxu0 %v1194_v16  ;;  %v1345_v21 = vmax.f32 %v1275_v18, 0.0 }
 0x33e   : > { %v1112_v17 = vpop.f32.mrf.mxu3  ;;  %2079 = vmatpush.bf16.msra.mxu0 %v2764_v12 }
 0x33f   : > { %v1113_v44 = vadd.f32 %v3283_v39, %v1112_v17 }
 0x341   : > { %v1156_v25 = vmax.f32 %v1113_v44, 0.0 }
 0x342   : > { %v1276_v19 = vpop.f32.mrf.mxu0 }
 0x343   : > { %v1277_v20 = vadd.f32 %v3317_v32, %v1276_v19 }
 0x345   : > { %v1346_v22 = vmax.f32 %v1277_v20, 0.0 }
 0x346   : > { %v1114_v23 = vpop.f32.mrf.mxu3 }
 0x347   : > { %v1115_v28 = vadd.f32 %v3283_v39, %v1114_v23  ;;  %v1393_v24 = vpack.c.bf16 %v1346_v22, %v1345_v21 }
 0x349   : > { %v1157_v26 = vmax.f32 %v1115_v28, 0.0  ;;  %1480 = vmatmul.bf16.gmra.mxu1 %v1393_v24 }
 0x34a   : > { %v1279_v27 = vpop.f32.mrf.mxu0 }
 0x34b   : > { %v1195_v29 = vpack.c.bf16 %v1157_v26, %v1156_v25  ;;  %v1280_v31 = vadd.f32 %v3317_v32, %v1279_v27  ;;  %v3351_v25 = vld [vmem:[#allocation7 + $0x5] ss:$0 sm:$0xff]  ;;  %v2753_v26 = vld [vmem:[#allocation5 + $0x1d8] sm:$0xff] }
 0x34c   : > { %1875 = vmatpush.bf16.msra.mxu3 %v2753_v26 }
 0x34d   : > { %1318 = vmatmul.bf16.gmra.mxu0 %v1195_v29  ;;  %v1347_v35 = vmax.f32 %v1280_v31, 0.0 }
 0x34e   : > { %v1117_v30 = vpop.f32.mrf.mxu3 }
 0x34f   : > { %v1118_v36 = vadd.f32 %v3283_v39, %v1117_v30 }
 0x351   : > { %v1158_v43 = vmax.f32 %v1118_v36, 0.0 }
 0x352   : > { %v1281_v33 = vpop.f32.mrf.mxu0 }
 0x353   : > { %v1282_v34 = vadd.f32 %v3317_v32, %v1281_v33 }
 0x355   : > { %v1348_v37 = vmax.f32 %v1282_v34, 0.0 }
 0x356   : > { %v1119_v40 = vpop.f32.mrf.mxu3 }
 0x357   : > { %v1120_v41 = vadd.f32 %v3283_v39, %v1119_v40  ;;  %v1394_v42 = vpack.c.bf16 %v1348_v37, %v1347_v35 }
 0x359   : > { %v1159_v45 = vmax.f32 %v1120_v41, 0.0  ;;  %1485 = vmatmul.bf16.gmra.mxu1 %v1394_v42 }
 0x35a   : > { %v1284_v47 = vpop.f32.mrf.mxu0 }
 0x35b   : > { %v1196_v48 = vpack.c.bf16 %v1159_v45, %v1158_v43  ;;  %v1285_v50 = vadd.f32 %v3317_v32, %v1284_v47 }
 0x35d   : > { %1323 = vmatmul.bf16.gmra.mxu0 %v1196_v48  ;;  %v1349_v53 = vmax.f32 %v1285_v50, 0.0 }
 0x35e   : > { %v1122_v49 = vpop.f32.mrf.mxu3 }
 0x35f   : > { %v1123_v54 = vadd.f32 %v3283_v39, %v1122_v49 }
 0x361   : > { %v1160_v60 = vmax.f32 %v1123_v54, 0.0 }
 0x362   : > { %v1286_v51 = vpop.f32.mrf.mxu0 }
 0x363   : > { %v1287_v52 = vadd.f32 %v3317_v32, %v1286_v51 }
 0x365   : > { %v1350_v55 = vmax.f32 %v1287_v52, 0.0 }
 0x366   : > { %v1124_v57 = vpop.f32.mrf.mxu3 }
 0x367   : > { %v1125_v58 = vadd.f32 %v3283_v39, %v1124_v57  ;;  %v1395_v59 = vpack.c.bf16 %v1350_v55, %v1349_v53 }
 0x369   : > { %v1161_v61 = vmax.f32 %v1125_v58, 0.0  ;;  %1490 = vmatmul.bf16.gmra.mxu1 %v1395_v59 }
 0x36a   : > { %v1289_v62 = vpop.f32.mrf.mxu0 }
 0x36b   : > { %v1197_v63 = vpack.c.bf16 %v1161_v61, %v1160_v60  ;;  %v1290_v1 = vadd.f32 %v3317_v32, %v1289_v62  ;;  %v2752_v61 = vld [vmem:[#allocation5 + $0x1d0] sm:$0xff] }
 0x36c   : > { %1876 = vmatpush.bf16.msra.mxu3 %v2752_v61 }
 0x36d   : > { %1328 = vmatmul.bf16.gmra.mxu0 %v1197_v63  ;;  %v1351_v4 = vmax.f32 %v1290_v1, 0.0 }
 0x36e   : > { %v1127_v0 = vpop.f32.mrf.mxu3 }
 0x36f   : > { %v1128_v5 = vadd.f32 %v3283_v39, %v1127_v0 }
 0x371   : > { %v1162_v10 = vmax.f32 %v1128_v5, 0.0 }
 0x372   : > { %v1291_v2 = vpop.f32.mrf.mxu0 }
 0x373   : > { %v1292_v3 = vadd.f32 %v3317_v32, %v1291_v2 }
 0x375   : > { %v1352_v6 = vmax.f32 %v1292_v3, 0.0 }
 0x376   : > { %v1129_v7 = vpop.f32.mrf.mxu3 }
 0x377   : > { %v1130_v8 = vadd.f32 %v3283_v39, %v1129_v7  ;;  %v1396_v9 = vpack.c.bf16 %v1352_v6, %v1351_v4 }
 0x379   : > { %v1163_v11 = vmax.f32 %v1130_v8, 0.0  ;;  %1495 = vmatmul.bf16.gmra.mxu1 %v1396_v9 }
 0x37a   : > { %v1294_v13 = vpop.f32.mrf.mxu0 }
 0x37b   : > { %v1198_v14 = vpack.c.bf16 %v1163_v11, %v1162_v10  ;;  %v1295_v15 = vadd.f32 %v3317_v32, %v1294_v13 }
 0x37d   : > { %1333 = vmatmul.bf16.gmra.mxu0 %v1198_v14  ;;  %v1353_v18 = vmax.f32 %v1295_v15, 0.0 }
 0x382   : > { %v1296_v16 = vpop.f32.mrf.mxu0 }
 0x383   : > { %v1297_v17 = vadd.f32 %v3317_v32, %v1296_v16 }
 0x385   : > { %v1354_v19 = vmax.f32 %v1297_v17, 0.0 }
 0x387   : > { %v1397_v20 = vpack.c.bf16 %v1354_v19, %v1353_v18 }
 0x389   : > { %1500 = vmatmul.bf16.gmra.mxu1 %v1397_v20 }
 0x38a   : > { %v1299_v21 = vpop.f32.mrf.mxu0 }
 0x38b   : > { %v1300_v39 = vadd.f32 %v3317_v32, %v1299_v21 }
 0x38d   : > { %v1355_v38 = vmax.f32 %v1300_v39, 0.0 }
 0x392   : > { %v1301_v44 = vpop.f32.mrf.mxu0 }
 0x393   : > { %v1302_v22 = vadd.f32 %v3317_v32, %v1301_v44 }
 0x395   : > { %v1356_v23 = vmax.f32 %v1302_v22, 0.0 }
 0x396   : > { %v1466_v28 = vpop.f32.mrf.mxu1 }
 0x397   : > { %v1398_v24 = vpack.c.bf16 %v1356_v23, %v1355_v38  ;;  %v1467_v29 = vadd.f32 %v3351_v25, %v1466_v28  ;;  %v2751_v28 = vld [vmem:[#allocation5 + $0x1c8] sm:$0xff] }
 0x398   : > { %1877 = vmatpush.bf16.msra.mxu3 %v2751_v28 }
 0x399   : > { %1505 = vmatmul.bf16.gmra.mxu1 %v1398_v24  ;;  %v1546_v33 = vmax.f32 %v1467_v29, 0.0 }
 0x39a   : > { %v1304_v27 = vpop.f32.mrf.mxu0 }
 0x39b   : > { %v1305_v34 = vadd.f32 %v3317_v32, %v1304_v27 }
 0x39d   : > { %v1357_v41 = vmax.f32 %v1305_v34, 0.0 }
 0x39e   : > { %v1468_v30 = vpop.f32.mrf.mxu1 }
 0x39f   : > { %v1469_v31 = vadd.f32 %v3351_v25, %v1468_v30 }
 0x3a1   : > { %v1547_v35 = vmax.f32 %v1469_v31, 0.0 }
 0x3a2   : > { %v1306_v36 = vpop.f32.mrf.mxu0 }
 0x3a3   : > { %v1597_v37 = vpack.c.bf16 %v1547_v35, %v1546_v33  ;;  %v1307_v40 = vadd.f32 %v3317_v32, %v1306_v36 }
 0x3a5   : > { %v1358_v42 = vmax.f32 %v1307_v40, 0.0  ;;  %1672 = vmatmul.bf16.vlgmr.msra.gmra.mxu2 %v1597_v37 }
 0x3a6   : > { %v1471_v43 = vpop.f32.mrf.mxu1 }
 0x3a7   : > { %v1399_v45 = vpack.c.bf16 %v1358_v42, %v1357_v41  ;;  %v1472_v48 = vadd.f32 %v3351_v25, %v1471_v43  ;;  %v2763_v43 = vld [vmem:[#allocation5 + $0x228] sm:$0xff] }
 0x3a8   : > { %2080 = vmatpush.bf16.msra.mxu0 %v2763_v43 }
 0x3a9   : > { %1510 = vmatmul.bf16.gmra.mxu1 %v1399_v45  ;;  %v1548_v51 = vmax.f32 %v1472_v48, 0.0 }
 0x3aa   : > { %v1309_v47 = vpop.f32.mrf.mxu0 }
 0x3ab   : > { %v1310_v52 = vadd.f32 %v3317_v32, %v1309_v47 }
 0x3ad   : > { %v1359_v57 = vmax.f32 %v1310_v52, 0.0 }
 0x3ae   : > { %v1473_v49 = vpop.f32.mrf.mxu1 }
 0x3af   : > { %v1474_v50 = vadd.f32 %v3351_v25, %v1473_v49 }
 0x3b1   : > { %v1549_v53 = vmax.f32 %v1474_v50, 0.0 }
 0x3b2   : > { %v1311_v54 = vpop.f32.mrf.mxu0 }
 0x3b3   : > { %v1312_v55 = vadd.f32 %v3317_v32, %v1311_v54  ;;  %v1598_v56 = vpack.c.bf16 %v1549_v53, %v1548_v51 }
 0x3b5   : > { %v1360_v58 = vmax.f32 %v1312_v55, 0.0  ;;  %1677 = vmatmul.bf16.gmra.mxu2 %v1598_v56 }
 0x3b6   : > { %v1476_v59 = vpop.f32.mrf.mxu1 }
 0x3b7   : > { %v1400_v60 = vpack.c.bf16 %v1360_v58, %v1359_v57  ;;  %v1477_v63 = vadd.f32 %v3351_v25, %v1476_v59  ;;  %v2750_v59 = vld [vmem:[#allocation5 + $0x1c0] sm:$0xff] }
 0x3b8   : > { %1878 = vmatpush.bf16.msra.mxu3 %v2750_v59 }
 0x3b9   : > { %1515 = vmatmul.bf16.gmra.mxu1 %v1400_v60  ;;  %v1550_v2 = vmax.f32 %v1477_v63, 0.0 }
 0x3ba   : > { %v1314_v62 = vpop.f32.mrf.mxu0 }
 0x3bb   : > { %v1315_v3 = vadd.f32 %v3317_v32, %v1314_v62 }
 0x3bd   : > { %v1361_v8 = vmax.f32 %v1315_v3, 0.0 }
 0x3be   : > { %v1478_v0 = vpop.f32.mrf.mxu1 }
 0x3bf   : > { %v1479_v1 = vadd.f32 %v3351_v25, %v1478_v0 }
 0x3c1   : > { %v1551_v4 = vmax.f32 %v1479_v1, 0.0 }
 0x3c2   : > { %v1316_v5 = vpop.f32.mrf.mxu0 }
 0x3c3   : > { %v1317_v6 = vadd.f32 %v3317_v32, %v1316_v5  ;;  %v1599_v7 = vpack.c.bf16 %v1551_v4, %v1550_v2 }
 0x3c5   : > { %v1362_v9 = vmax.f32 %v1317_v6, 0.0  ;;  %1682 = vmatmul.bf16.gmra.mxu2 %v1599_v7 }
 0x3c6   : > { %v1481_v10 = vpop.f32.mrf.mxu1 }
 0x3c7   : > { %v1401_v11 = vpack.c.bf16 %v1362_v9, %v1361_v8  ;;  %v1482_v14 = vadd.f32 %v3351_v25, %v1481_v10  ;;  %v2762_v10 = vld [vmem:[#allocation5 + $0x220] sm:$0xff] }
 0x3c8   : > { %2081 = vmatpush.bf16.msra.mxu0 %v2762_v10 }
 0x3c9   : > { %1520 = vmatmul.bf16.gmra.mxu1 %v1401_v11  ;;  %v1552_v17 = vmax.f32 %v1482_v14, 0.0 }
 0x3ca   : > { %v1319_v13 = vpop.f32.mrf.mxu0 }
 0x3cb   : > { %v1320_v18 = vadd.f32 %v3317_v32, %v1319_v13 }
 0x3cd   : > { %v1363_v44 = vmax.f32 %v1320_v18, 0.0 }
 0x3ce   : > { %v1483_v15 = vpop.f32.mrf.mxu1 }
 0x3cf   : > { %v1484_v16 = vadd.f32 %v3351_v25, %v1483_v15 }
 0x3d1   : > { %v1553_v19 = vmax.f32 %v1484_v16, 0.0 }
 0x3d2   : > { %v1321_v20 = vpop.f32.mrf.mxu0 }
 0x3d3   : > { %v1322_v21 = vadd.f32 %v3317_v32, %v1321_v20  ;;  %v1600_v39 = vpack.c.bf16 %v1553_v19, %v1552_v17 }
 0x3d5   : > { %v1364_v22 = vmax.f32 %v1322_v21, 0.0  ;;  %1687 = vmatmul.bf16.gmra.mxu2 %v1600_v39 }
 0x3d6   : > { %v1486_v38 = vpop.f32.mrf.mxu1 }
 0x3d7   : > { %v1402_v23 = vpack.c.bf16 %v1364_v22, %v1363_v44  ;;  %v1487_v26 = vadd.f32 %v3351_v25, %v1486_v38  ;;  %v3385_v38 = vld [vmem:[#allocation7 + $0x6] ss:$0 sm:$0xff] }
 0x3d9   : > { %1525 = vmatmul.bf16.gmra.mxu1 %v1402_v23  ;;  %v1554_v30 = vmax.f32 %v1487_v26, 0.0  ;;  %v2761_v23 = vld [vmem:[#allocation5 + $0x218] sm:$0xff] }
 0x3da   : > { %v1324_v24 = vpop.f32.mrf.mxu0  ;;  %2082 = vmatpush.bf16.msra.mxu0 %v2761_v23 }
 0x3db   : > { %v1325_v31 = vadd.f32 %v3317_v32, %v1324_v24 }
 0x3dd   : > { %v1365_v37 = vmax.f32 %v1325_v31, 0.0 }
 0x3de   : > { %v1488_v27 = vpop.f32.mrf.mxu1 }
 0x3df   : > { %v1489_v29 = vadd.f32 %v3351_v25, %v1488_v27 }
 0x3e1   : > { %v1555_v33 = vmax.f32 %v1489_v29, 0.0 }
 0x3e2   : > { %v1326_v34 = vpop.f32.mrf.mxu0 }
 0x3e3   : > { %v1601_v35 = vpack.c.bf16 %v1555_v33, %v1554_v30  ;;  %v1327_v36 = vadd.f32 %v3317_v32, %v1326_v34 }
 0x3e5   : > { %v1366_v40 = vmax.f32 %v1327_v36, 0.0  ;;  %1692 = vmatmul.bf16.gmra.mxu2 %v1601_v35 }
 0x3e6   : > { %v1491_v41 = vpop.f32.mrf.mxu1 }
 0x3e7   : > { %v1403_v42 = vpack.c.bf16 %v1366_v40, %v1365_v37  ;;  %v1492_v46 = vadd.f32 %v3351_v25, %v1491_v41 }
 0x3e9   : > { %1530 = vmatmul.bf16.gmra.mxu1 %v1403_v42  ;;  %v1556_v49 = vmax.f32 %v1492_v46, 0.0 }
 0x3ea   : > { %v1329_v45 = vpop.f32.mrf.mxu0 }
 0x3eb   : > { %v1330_v50 = vadd.f32 %v3317_v32, %v1329_v45 }
 0x3ed   : > { %v1367_v55 = vmax.f32 %v1330_v50, 0.0 }
 0x3ee   : > { %v1493_v47 = vpop.f32.mrf.mxu1 }
 0x3ef   : > { %v1494_v48 = vadd.f32 %v3351_v25, %v1493_v47 }
 0x3f1   : > { %v1557_v51 = vmax.f32 %v1494_v48, 0.0 }
 0x3f2   : > { %v1331_v52 = vpop.f32.mrf.mxu0 }
 0x3f3   : > { %v1602_v53 = vpack.c.bf16 %v1557_v51, %v1556_v49  ;;  %v1332_v54 = vadd.f32 %v3317_v32, %v1331_v52 }
 0x3f5   : > { %v1368_v56 = vmax.f32 %v1332_v54, 0.0  ;;  %1697 = vmatmul.bf16.gmra.mxu2 %v1602_v53 }
 0x3f6   : > { %v1496_v57 = vpop.f32.mrf.mxu1 }
 0x3f7   : > { %v1404_v58 = vpack.c.bf16 %v1368_v56, %v1367_v55  ;;  %v1497_v61 = vadd.f32 %v3351_v25, %v1496_v57  ;;  %v2760_v57 = vld [vmem:[#allocation5 + $0x210] sm:$0xff] }
 0x3f8   : > { %2083 = vmatpush.bf16.msra.mxu0 %v2760_v57 }
 0x3f9   : > { %1535 = vmatmul.bf16.gmra.mxu1 %v1404_v58  ;;  %v1558_v0 = vmax.f32 %v1497_v61, 0.0 }
 0x3fa   : > { %v1334_v60 = vpop.f32.mrf.mxu0 }
 0x3fb   : > { %v1335_v1 = vadd.f32 %v3317_v32, %v1334_v60 }
 0x3fd   : > { %v1369_v6 = vmax.f32 %v1335_v1, 0.0 }
 0x3fe   : > { %v1498_v62 = vpop.f32.mrf.mxu1 }
 0x3ff   : > { %v1499_v63 = vadd.f32 %v3351_v25, %v1498_v62 }
 0x401   : > { %v1559_v2 = vmax.f32 %v1499_v63, 0.0 }
 0x402   : > { %v1336_v3 = vpop.f32.mrf.mxu0 }
 0x403   : > { %v1603_v4 = vpack.c.bf16 %v1559_v2, %v1558_v0  ;;  %v1337_v5 = vadd.f32 %v3317_v32, %v1336_v3 }
 0x405   : > { %v1370_v7 = vmax.f32 %v1337_v5, 0.0  ;;  %1702 = vmatmul.bf16.gmra.mxu2 %v1603_v4 }
 0x406   : > { %v1501_v8 = vpop.f32.mrf.mxu1 }
 0x407   : > { %v1405_v9 = vpack.c.bf16 %v1370_v7, %v1369_v6  ;;  %v1502_v11 = vadd.f32 %v3351_v25, %v1501_v8 }
 0x409   : > { %1540 = vmatmul.bf16.gmra.mxu1 %v1405_v9  ;;  %v1560_v14 = vmax.f32 %v1502_v11, 0.0 }
 0x40e   : > { %v1503_v12 = vpop.f32.mrf.mxu1 }
 0x40f   : > { %v1504_v13 = vadd.f32 %v3351_v25, %v1503_v12 }
 0x411   : > { %v1561_v15 = vmax.f32 %v1504_v13, 0.0 }
 0x413   : > { %v1604_v16 = vpack.c.bf16 %v1561_v15, %v1560_v14 }
 0x415   : > { %1707 = vmatmul.bf16.gmra.mxu2 %v1604_v16 }
 0x416   : > { %v1506_v17 = vpop.f32.mrf.mxu1 }
 0x417   : > { %v1507_v32 = vadd.f32 %v3351_v25, %v1506_v17 }
 0x419   : > { %v1562_v20 = vmax.f32 %v1507_v32, 0.0 }
 0x41e   : > { %v1508_v18 = vpop.f32.mrf.mxu1 }
 0x41f   : > { %v1509_v19 = vadd.f32 %v3351_v25, %v1508_v18 }
 0x421   : > { %v1563_v21 = vmax.f32 %v1509_v19, 0.0 }
 0x423   : > { %v1605_v39 = vpack.c.bf16 %v1563_v21, %v1562_v20  ;;  %v2759_v21 = vld [vmem:[#allocation5 + $0x208] sm:$0xff] }
 0x424   : > { %2084 = vmatpush.bf16.msra.mxu0 %v2759_v21 }
 0x425   : > { %1712 = vmatmul.bf16.gmra.mxu2 %v1605_v39 }
 0x426   : > { %v1511_v44 = vpop.f32.mrf.mxu1 }
 0x427   : > { %v1512_v28 = vadd.f32 %v3351_v25, %v1511_v44 }
 0x428   : > { %v1673_v22 = vpop.f32.mrf.mxu2 }
 0x429   : > { %v1674_v26 = vadd.f32 %v3385_v38, %v1673_v22  ;;  %v1564_v30 = vmax.f32 %v1512_v28, 0.0 }
 0x42b   : > { %v1753_v34 = vmax.f32 %v1674_v26, 0.0 }
 0x42e   : > { %v1513_v24 = vpop.f32.mrf.mxu1 }
 0x42f   : > { %v1514_v27 = vadd.f32 %v3351_v25, %v1513_v24 }
 0x430   : > { %v1675_v29 = vpop.f32.mrf.mxu2 }
 0x431   : > { %v1565_v31 = vmax.f32 %v1514_v27, 0.0  ;;  %v1676_v33 = vadd.f32 %v3385_v38, %v1675_v29 }
 0x433   : > { %v1606_v35 = vpack.c.bf16 %v1565_v31, %v1564_v30  ;;  %v1754_v36 = vmax.f32 %v1676_v33, 0.0 }
 0x435   : > { %v1804_v37 = vpack.c.bf16 %v1754_v36, %v1753_v34  ;;  %1717 = vmatmul.bf16.gmra.mxu2 %v1606_v35 }
 0x436   : > { %v1516_v40 = vpop.f32.mrf.mxu1 }
 0x437   : > { %1879 = vmatmul.bf16.vlgmr.msra.gmra.mxu3 %v1804_v37  ;;  %v1517_v42 = vadd.f32 %v3351_v25, %v1516_v40 }
 0x438   : > { %v1678_v41 = vpop.f32.mrf.mxu2 }
 0x439   : > { %v1679_v45 = vadd.f32 %v3385_v38, %v1678_v41  ;;  %v1566_v48 = vmax.f32 %v1517_v42, 0.0 }
 0x43b   : > { %v1755_v51 = vmax.f32 %v1679_v45, 0.0 }
 0x43e   : > { %v1518_v43 = vpop.f32.mrf.mxu1 }
 0x43f   : > { %v1519_v46 = vadd.f32 %v3351_v25, %v1518_v43 }
 0x440   : > { %v1680_v47 = vpop.f32.mrf.mxu2 }
 0x441   : > { %v1567_v49 = vmax.f32 %v1519_v46, 0.0  ;;  %v1681_v50 = vadd.f32 %v3385_v38, %v1680_v47 }
 0x443   : > { %v1607_v52 = vpack.c.bf16 %v1567_v49, %v1566_v48  ;;  %v1756_v53 = vmax.f32 %v1681_v50, 0.0 }
 0x445   : > { %1722 = vmatmul.bf16.gmra.mxu2 %v1607_v52  ;;  %v1805_v54 = vpack.c.bf16 %v1756_v53, %v1755_v51  ;;  %v2758_v53 = vld [vmem:[#allocation5 + $0x200] sm:$0xff] }
 0x446   : > { %v1521_v55 = vpop.f32.mrf.mxu1  ;;  %2085 = vmatpush.bf16.msra.mxu0 %v2758_v53 }
 0x447   : > { %1884 = vmatmul.bf16.gmra.mxu3 %v1805_v54  ;;  %v1522_v58 = vadd.f32 %v3351_v25, %v1521_v55 }
 0x448   : > { %v1683_v56 = vpop.f32.mrf.mxu2 }
 0x449   : > { %v1684_v60 = vadd.f32 %v3385_v38, %v1683_v56  ;;  %v1568_v63 = vmax.f32 %v1522_v58, 0.0 }
 0x44b   : > { %v1757_v2 = vmax.f32 %v1684_v60, 0.0 }
 0x44e   : > { %v1523_v59 = vpop.f32.mrf.mxu1 }
 0x44f   : > { %v1524_v61 = vadd.f32 %v3351_v25, %v1523_v59 }
 0x450   : > { %v1685_v62 = vpop.f32.mrf.mxu2 }
 0x451   : > { %v1569_v0 = vmax.f32 %v1524_v61, 0.0  ;;  %v1686_v1 = vadd.f32 %v3385_v38, %v1685_v62 }
 0x453   : > { %v1608_v3 = vpack.c.bf16 %v1569_v0, %v1568_v63  ;;  %v1758_v4 = vmax.f32 %v1686_v1, 0.0 }
 0x455   : > { %1727 = vmatmul.bf16.gmra.mxu2 %v1608_v3  ;;  %v1806_v5 = vpack.c.bf16 %v1758_v4, %v1757_v2 }
 0x456   : > { %v1526_v6 = vpop.f32.mrf.mxu1 }
 0x457   : > { %1889 = vmatmul.bf16.gmra.mxu3 %v1806_v5  ;;  %v1527_v8 = vadd.f32 %v3351_v25, %v1526_v6 }
 0x458   : > { %v1688_v7 = vpop.f32.mrf.mxu2 }
 0x459   : > { %v1689_v10 = vadd.f32 %v3385_v38, %v1688_v7  ;;  %v1570_v13 = vmax.f32 %v1527_v8, 0.0 }
 0x45b   : > { %v1759_v16 = vmax.f32 %v1689_v10, 0.0 }
 0x45e   : > { %v1528_v9 = vpop.f32.mrf.mxu1 }
 0x45f   : > { %v1529_v11 = vadd.f32 %v3351_v25, %v1528_v9 }
 0x460   : > { %v1690_v12 = vpop.f32.mrf.mxu2 }
 0x461   : > { %v1571_v14 = vmax.f32 %v1529_v11, 0.0  ;;  %v1691_v15 = vadd.f32 %v3385_v38, %v1690_v12 }
 0x463   : > { %v1609_v17 = vpack.c.bf16 %v1571_v14, %v1570_v13  ;;  %v1760_v32 = vmax.f32 %v1691_v15, 0.0 }
 0x465   : > { %1732 = vmatmul.bf16.gmra.mxu2 %v1609_v17  ;;  %v1807_v18 = vpack.c.bf16 %v1760_v32, %v1759_v16  ;;  %v3419_v17 = vld [vmem:[#allocation7 + $0x7] ss:$0 sm:$0xff] }
 0x466   : > { %v1531_v19 = vpop.f32.mrf.mxu1 }
 0x467   : > { %1894 = vmatmul.bf16.gmra.mxu3 %v1807_v18  ;;  %v1532_v39 = vadd.f32 %v3351_v25, %v1531_v19 }
 0x468   : > { %v1693_v20 = vpop.f32.mrf.mxu2 }
 0x469   : > { %v1694_v22 = vadd.f32 %v3385_v38, %v1693_v20  ;;  %v1572_v24 = vmax.f32 %v1532_v39, 0.0 }
 0x46b   : > { %v1761_v29 = vmax.f32 %v1694_v22, 0.0 }
 0x46e   : > { %v1533_v44 = vpop.f32.mrf.mxu1 }
 0x46f   : > { %v1534_v23 = vadd.f32 %v3351_v25, %v1533_v44 }
 0x470   : > { %v1695_v28 = vpop.f32.mrf.mxu2 }
 0x471   : > { %v1573_v26 = vmax.f32 %v1534_v23, 0.0  ;;  %v1696_v27 = vadd.f32 %v3385_v38, %v1695_v28 }
 0x473   : > { %v1610_v30 = vpack.c.bf16 %v1573_v26, %v1572_v24  ;;  %v1762_v31 = vmax.f32 %v1696_v27, 0.0 }
 0x475   : > { %v1808_v33 = vpack.c.bf16 %v1762_v31, %v1761_v29  ;;  %1737 = vmatmul.bf16.gmra.mxu2 %v1610_v30 }
 0x476   : > { %v1536_v34 = vpop.f32.mrf.mxu1 }
 0x477   : > { %1899 = vmatmul.bf16.gmra.mxu3 %v1808_v33  ;;  %v1537_v36 = vadd.f32 %v3351_v25, %v1536_v34 }
 0x478   : > { %v1698_v35 = vpop.f32.mrf.mxu2 }
 0x479   : > { %v1699_v40 = vadd.f32 %v3385_v38, %v1698_v35  ;;  %v1574_v43 = vmax.f32 %v1537_v36, 0.0 }
 0x47b   : > { %v1763_v47 = vmax.f32 %v1699_v40, 0.0 }
 0x47e   : > { %v1538_v37 = vpop.f32.mrf.mxu1 }
 0x47f   : > { %v1539_v41 = vadd.f32 %v3351_v25, %v1538_v37 }
 0x480   : > { %v1700_v42 = vpop.f32.mrf.mxu2 }
 0x481   : > { %v1575_v45 = vmax.f32 %v1539_v41, 0.0  ;;  %v1701_v46 = vadd.f32 %v3385_v38, %v1700_v42 }
 0x483   : > { %v1611_v48 = vpack.c.bf16 %v1575_v45, %v1574_v43  ;;  %v1764_v49 = vmax.f32 %v1701_v46, 0.0 }
 0x485   : > { %v1809_v50 = vpack.c.bf16 %v1764_v49, %v1763_v47  ;;  %1742 = vmatmul.bf16.gmra.mxu2 %v1611_v48 }
 0x486   : > { %v1541_v51 = vpop.f32.mrf.mxu1 }
 0x487   : > { %1904 = vmatmul.bf16.gmra.mxu3 %v1809_v50  ;;  %v1542_v54 = vadd.f32 %v3351_v25, %v1541_v51 }
 0x488   : > { %v1703_v52 = vpop.f32.mrf.mxu2 }
 0x489   : > { %v1704_v56 = vadd.f32 %v3385_v38, %v1703_v52  ;;  %v1576_v59 = vmax.f32 %v1542_v54, 0.0 }
 0x48b   : > { %v1765_v62 = vmax.f32 %v1704_v56, 0.0 }
 0x48e   : > { %v1543_v55 = vpop.f32.mrf.mxu1 }
 0x48f   : > { %v1544_v57 = vadd.f32 %v3351_v25, %v1543_v55 }
 0x490   : > { %v1705_v58 = vpop.f32.mrf.mxu2 }
 0x491   : > { %v1577_v60 = vmax.f32 %v1544_v57, 0.0  ;;  %v1706_v61 = vadd.f32 %v3385_v38, %v1705_v58 }
 0x493   : > { %v1612_v63 = vpack.c.bf16 %v1577_v60, %v1576_v59  ;;  %v1766_v0 = vmax.f32 %v1706_v61, 0.0 }
 0x495   : > { %v1810_v1 = vpack.c.bf16 %v1766_v0, %v1765_v62  ;;  %1747 = vmatmul.bf16.gmra.mxu2 %v1612_v63 }
 0x497   : > { %1909 = vmatmul.bf16.gmra.mxu3 %v1810_v1 }
 0x498   : > { %v1708_v2 = vpop.f32.mrf.mxu2 }
 0x499   : > { %v1709_v3 = vadd.f32 %v3385_v38, %v1708_v2 }
 0x49b   : > { %v1767_v6 = vmax.f32 %v1709_v3, 0.0 }
 0x4a0   : > { %v1710_v4 = vpop.f32.mrf.mxu2 }
 0x4a1   : > { %v1711_v5 = vadd.f32 %v3385_v38, %v1710_v4 }
 0x4a3   : > { %v1768_v7 = vmax.f32 %v1711_v5, 0.0 }
 0x4a5   : > { %v1811_v25 = vpack.c.bf16 %v1768_v7, %v1767_v6 }
 0x4a7   : > { %1914 = vmatmul.bf16.gmra.mxu3 %v1811_v25 }
 0x4a8   : > { %v1713_v8 = vpop.f32.mrf.mxu2 }
 0x4a9   : > { %v1714_v9 = vadd.f32 %v3385_v38, %v1713_v8 }
 0x4ab   : > { %v1769_v12 = vmax.f32 %v1714_v9, 0.0 }
 0x4b0   : > { %v1715_v10 = vpop.f32.mrf.mxu2 }
 0x4b1   : > { %v1716_v11 = vadd.f32 %v3385_v38, %v1715_v10 }
 0x4b3   : > { %v1770_v13 = vmax.f32 %v1716_v11, 0.0 }
 0x4b5   : > { %v1812_v14 = vpack.c.bf16 %v1770_v13, %v1769_v12 }
 0x4b7   : > { %1919 = vmatmul.bf16.gmra.mxu3 %v1812_v14 }
 0x4b8   : > { %v1718_v15 = vpop.f32.mrf.mxu2 }
 0x4b9   : > { %v1719_v32 = vadd.f32 %v3385_v38, %v1718_v15 }
 0x4ba   : > { %v1880_v16 = vpop.f32.mrf.mxu3 }
 0x4bb   : > { %v1881_v19 = vadd.f32 %v3419_v17, %v1880_v16  ;;  %v1771_v39 = vmax.f32 %v1719_v32, 0.0 }
 0x4bd   : > { %v1960_v23 = vmax.f32 %v1881_v19, 0.0 }
 0x4c0   : > { %v1720_v18 = vpop.f32.mrf.mxu2 }
 0x4c1   : > { %v1721_v20 = vadd.f32 %v3385_v38, %v1720_v18 }
 0x4c2   : > { %v1882_v21 = vpop.f32.mrf.mxu3 }
 0x4c3   : > { %v1772_v44 = vmax.f32 %v1721_v20, 0.0  ;;  %v1883_v22 = vadd.f32 %v3419_v17, %v1882_v21 }
 0x4c5   : > { %v1813_v28 = vpack.c.bf16 %v1772_v44, %v1771_v39  ;;  %v1961_v24 = vmax.f32 %v1883_v22, 0.0 }
 0x4c7   : > { %v2011_v26 = vpack.c.bf16 %v1961_v24, %v1960_v23  ;;  %1924 = vmatmul.bf16.gmra.mxu3 %v1813_v28 }
 0x4c8   : > { %v1723_v27 = vpop.f32.mrf.mxu2 }
 0x4c9   : > { %2086 = vmatmul.bf16.vlgmr.msra.gmra.mxu0 %v2011_v26  ;;  %v1724_v30 = vadd.f32 %v3385_v38, %v1723_v27 }
 0x4ca   : > { %v1885_v29 = vpop.f32.mrf.mxu3 }
 0x4cb   : > { %v1886_v33 = vadd.f32 %v3419_v17, %v1885_v29  ;;  %v1773_v36 = vmax.f32 %v1724_v30, 0.0 }
 0x4cd   : > { %v1962_v41 = vmax.f32 %v1886_v33, 0.0 }
 0x4d0   : > { %v1725_v31 = vpop.f32.mrf.mxu2 }
 0x4d1   : > { %v1726_v34 = vadd.f32 %v3385_v38, %v1725_v31 }
 0x4d2   : > { %v1887_v35 = vpop.f32.mrf.mxu3 }
 0x4d3   : > { %v1774_v37 = vmax.f32 %v1726_v34, 0.0  ;;  %v1888_v40 = vadd.f32 %v3419_v17, %v1887_v35 }
 0x4d5   : > { %v1814_v42 = vpack.c.bf16 %v1774_v37, %v1773_v36  ;;  %v1963_v43 = vmax.f32 %v1888_v40, 0.0 }
 0x4d7   : > { %1929 = vmatmul.bf16.gmra.mxu3 %v1814_v42  ;;  %v2012_v45 = vpack.c.bf16 %v1963_v43, %v1962_v41 }
 0x4d8   : > { %v1728_v46 = vpop.f32.mrf.mxu2 }
 0x4d9   : > { %2091 = vmatmul.bf16.gmra.mxu0 %v2012_v45  ;;  %v1729_v48 = vadd.f32 %v3385_v38, %v1728_v46 }
 0x4da   : > { %v1890_v47 = vpop.f32.mrf.mxu3 }
 0x4db   : > { %v1891_v50 = vadd.f32 %v3419_v17, %v1890_v47  ;;  %v1775_v53 = vmax.f32 %v1729_v48, 0.0 }
 0x4dd   : > { %v1964_v56 = vmax.f32 %v1891_v50, 0.0 }
 0x4e0   : > { %v1730_v49 = vpop.f32.mrf.mxu2 }
 0x4e1   : > { %v1731_v51 = vadd.f32 %v3385_v38, %v1730_v49 }
 0x4e2   : > { %v1892_v52 = vpop.f32.mrf.mxu3 }
 0x4e3   : > { %v1776_v54 = vmax.f32 %v1731_v51, 0.0  ;;  %v1893_v55 = vadd.f32 %v3419_v17, %v1892_v52 }
 0x4e5   : > { %v1815_v57 = vpack.c.bf16 %v1776_v54, %v1775_v53  ;;  %v1965_v58 = vmax.f32 %v1893_v55, 0.0 }
 0x4e7   : > { %1934 = vmatmul.bf16.gmra.mxu3 %v1815_v57  ;;  %v2013_v59 = vpack.c.bf16 %v1965_v58, %v1964_v56 }
 0x4e8   : > { %v1733_v60 = vpop.f32.mrf.mxu2 }
 0x4e9   : > { %2096 = vmatmul.bf16.gmra.mxu0 %v2013_v59  ;;  %v1734_v62 = vadd.f32 %v3385_v38, %v1733_v60 }
 0x4ea   : > { %v1895_v61 = vpop.f32.mrf.mxu3 }
 0x4eb   : > { %v1896_v0 = vadd.f32 %v3419_v17, %v1895_v61  ;;  %v1777_v3 = vmax.f32 %v1734_v62, 0.0 }
 0x4ed   : > { %v1966_v6 = vmax.f32 %v1896_v0, 0.0  ;;  %v3454_v0 = vld [vmem:[#allocation7 + $0x8] ss:$0 sm:$0xff] }
 0x4f0   : > { %v1735_v63 = vpop.f32.mrf.mxu2 }
 0x4f1   : > { %v1736_v1 = vadd.f32 %v3385_v38, %v1735_v63 }
 0x4f2   : > { %v1897_v2 = vpop.f32.mrf.mxu3 }
 0x4f3   : > { %v1778_v4 = vmax.f32 %v1736_v1, 0.0  ;;  %v1898_v5 = vadd.f32 %v3419_v17, %v1897_v2 }
 0x4f5   : > { %v1816_v7 = vpack.c.bf16 %v1778_v4, %v1777_v3  ;;  %v1967_v25 = vmax.f32 %v1898_v5, 0.0 }
 0x4f7   : > { %1939 = vmatmul.bf16.gmra.mxu3 %v1816_v7  ;;  %v2014_v8 = vpack.c.bf16 %v1967_v25, %v1966_v6 }
 0x4f8   : > { %v1738_v9 = vpop.f32.mrf.mxu2 }
 0x4f9   : > { %2101 = vmatmul.bf16.gmra.mxu0 %v2014_v8  ;;  %v1739_v11 = vadd.f32 %v3385_v38, %v1738_v9 }
 0x4fa   : > { %v1900_v10 = vpop.f32.mrf.mxu3 }
 0x4fb   : > { %v1901_v13 = vadd.f32 %v3419_v17, %v1900_v10  ;;  %v1779_v16 = vmax.f32 %v1739_v11, 0.0 }
 0x4fd   : > { %v1968_v19 = vmax.f32 %v1901_v13, 0.0 }
 0x500   : > { %v1740_v12 = vpop.f32.mrf.mxu2 }
 0x501   : > { %v1741_v14 = vadd.f32 %v3385_v38, %v1740_v12 }
 0x502   : > { %v1902_v15 = vpop.f32.mrf.mxu3 }
 0x503   : > { %v1780_v32 = vmax.f32 %v1741_v14, 0.0  ;;  %v1903_v18 = vadd.f32 %v3419_v17, %v1902_v15 }
 0x505   : > { %v1817_v20 = vpack.c.bf16 %v1780_v32, %v1779_v16  ;;  %v1969_v21 = vmax.f32 %v1903_v18, 0.0 }
 0x507   : > { %v2015_v39 = vpack.c.bf16 %v1969_v21, %v1968_v19  ;;  %1944 = vmatmul.bf16.gmra.mxu3 %v1817_v20 }
 0x508   : > { %v1743_v44 = vpop.f32.mrf.mxu2 }
 0x509   : > { %2106 = vmatmul.bf16.gmra.mxu0 %v2015_v39  ;;  %v1744_v23 = vadd.f32 %v3385_v38, %v1743_v44 }
 0x50a   : > { %v1905_v22 = vpop.f32.mrf.mxu3 }
 0x50b   : > { %v1906_v24 = vadd.f32 %v3419_v17, %v1905_v22  ;;  %v1781_v29 = vmax.f32 %v1744_v23, 0.0 }
 0x50d   : > { %v1970_v33 = vmax.f32 %v1906_v24, 0.0 }
 0x510   : > { %v1745_v28 = vpop.f32.mrf.mxu2 }
 0x511   : > { %v1746_v26 = vadd.f32 %v3385_v38, %v1745_v28 }
 0x512   : > { %v1907_v27 = vpop.f32.mrf.mxu3 }
 0x513   : > { %v1782_v30 = vmax.f32 %v1746_v26, 0.0  ;;  %v1908_v31 = vadd.f32 %v3419_v17, %v1907_v27 }
 0x515   : > { %v1818_v34 = vpack.c.bf16 %v1782_v30, %v1781_v29  ;;  %v1971_v35 = vmax.f32 %v1908_v31, 0.0 }
 0x517   : > { %v2016_v36 = vpack.c.bf16 %v1971_v35, %v1970_v33  ;;  %1949 = vmatmul.bf16.gmra.mxu3 %v1818_v34 }
 0x518   : > { %v1748_v37 = vpop.f32.mrf.mxu2 }
 0x519   : > { %2111 = vmatmul.bf16.gmra.mxu0 %v2016_v36  ;;  %v1749_v41 = vadd.f32 %v3385_v38, %v1748_v37 }
 0x51a   : > { %v1910_v40 = vpop.f32.mrf.mxu3 }
 0x51b   : > { %v1911_v43 = vadd.f32 %v3419_v17, %v1910_v40  ;;  %v1783_v47 = vmax.f32 %v1749_v41, 0.0 }
 0x51d   : > { %v1972_v50 = vmax.f32 %v1911_v43, 0.0 }
 0x520   : > { %v1750_v42 = vpop.f32.mrf.mxu2 }
 0x521   : > { %v1751_v45 = vadd.f32 %v3385_v38, %v1750_v42 }
 0x522   : > { %v1912_v46 = vpop.f32.mrf.mxu3 }
 0x523   : > { %v1784_v48 = vmax.f32 %v1751_v45, 0.0  ;;  %v1913_v49 = vadd.f32 %v3419_v17, %v1912_v46 }
 0x525   : > { %v1819_v51 = vpack.c.bf16 %v1784_v48, %v1783_v47  ;;  %v1973_v52 = vmax.f32 %v1913_v49, 0.0 }
 0x527   : > { %v2017_v53 = vpack.c.bf16 %v1973_v52, %v1972_v50  ;;  %1954 = vmatmul.bf16.gmra.mxu3 %v1819_v51 }
 0x529   : > { %2116 = vmatmul.bf16.gmra.mxu0 %v2017_v53 }
 0x52a   : > { %v1915_v54 = vpop.f32.mrf.mxu3 }
 0x52b   : > { %v1916_v55 = vadd.f32 %v3419_v17, %v1915_v54 }
 0x52d   : > { %v1974_v58 = vmax.f32 %v1916_v55, 0.0 }
 0x532   : > { %v1917_v56 = vpop.f32.mrf.mxu3 }
 0x533   : > { %v1918_v57 = vadd.f32 %v3419_v17, %v1917_v56 }
 0x535   : > { %v1975_v38 = vmax.f32 %v1918_v57, 0.0 }
 0x537   : > { %v2018_v59 = vpack.c.bf16 %v1975_v38, %v1974_v58 }
 0x539   : > { %2121 = vmatmul.bf16.gmra.mxu0 %v2018_v59 }
 0x53a   : > { %v1920_v60 = vpop.f32.mrf.mxu3 }
 0x53b   : > { %v1921_v61 = vadd.f32 %v3419_v17, %v1920_v60 }
 0x53d   : > { %v1976_v1 = vmax.f32 %v1921_v61, 0.0 }
 0x542   : > { %v1922_v62 = vpop.f32.mrf.mxu3 }
 0x543   : > { %v1923_v63 = vadd.f32 %v3419_v17, %v1922_v62 }
 0x545   : > { %v1977_v2 = vmax.f32 %v1923_v63, 0.0 }
 0x546   : > { %v2087_v3 = vpop.f32.mrf.mxu0 }
 0x547   : > { %v2019_v4 = vpack.c.bf16 %v1977_v2, %v1976_v1  ;;  %v2088_v5 = vadd.f32 %v3454_v0, %v2087_v3 }
 0x549   : > { %2167 = vst [vmem:[%s3457_s23] sm:$0xff] %v2088_v5  ;;  %2126 = vmatmul.bf16.gmra.mxu0 %v2019_v4 }
 0x54a   : > { %v1925_v6 = vpop.f32.mrf.mxu3 }
 0x54b   : > { %v1926_v8 = vadd.f32 %v3419_v17, %v1925_v6 }
 0x54d   : > { %v1978_v11 = vmax.f32 %v1926_v8, 0.0 }
 0x54e   : > { %v2089_v7 = vpop.f32.mrf.mxu0 }
 0x54f   : > { %v2090_v25 = vadd.f32 %v3454_v0, %v2089_v7 }
 0x551   : > { %2168 = vst [vmem:[%s3457_s23 + $0x8] sm:$0xff] %v2090_v25 }
 0x552   : > { %v1927_v9 = vpop.f32.mrf.mxu3 }
 0x553   : > { %v1928_v10 = vadd.f32 %v3419_v17, %v1927_v9 }
 0x555   : > { %v1979_v12 = vmax.f32 %v1928_v10, 0.0 }
 0x556   : > { %v2092_v13 = vpop.f32.mrf.mxu0 }
 0x557   : > { %v2020_v14 = vpack.c.bf16 %v1979_v12, %v1978_v11  ;;  %v2093_v15 = vadd.f32 %v3454_v0, %v2092_v13 }
 0x559   : > { %2169 = vst [vmem:[%s3457_s23 + $0x10] sm:$0xff] %v2093_v15  ;;  %2131 = vmatmul.bf16.gmra.mxu0 %v2020_v14 }
 0x55a   : > { %v1930_v16 = vpop.f32.mrf.mxu3 }
 0x55b   : > { %v1931_v19 = vadd.f32 %v3419_v17, %v1930_v16 }
 0x55d   : > { %v1980_v39 = vmax.f32 %v1931_v19, 0.0 }
 0x55e   : > { %v2094_v32 = vpop.f32.mrf.mxu0 }
 0x55f   : > { %v2095_v18 = vadd.f32 %v3454_v0, %v2094_v32 }
 0x561   : > { %2170 = vst [vmem:[%s3457_s23 + $0x18] sm:$0xff] %v2095_v18 }
 0x562   : > { %v1932_v20 = vpop.f32.mrf.mxu3 }
 0x563   : > { %v1933_v21 = vadd.f32 %v3419_v17, %v1932_v20 }
 0x565   : > { %v1981_v44 = vmax.f32 %v1933_v21, 0.0 }
 0x566   : > { %v2097_v22 = vpop.f32.mrf.mxu0 }
 0x567   : > { %v2021_v23 = vpack.c.bf16 %v1981_v44, %v1980_v39  ;;  %v2098_v28 = vadd.f32 %v3454_v0, %v2097_v22 }
 0x569   : > { %2171 = vst [vmem:[%s3457_s23 + $0x20] sm:$0xff] %v2098_v28  ;;  %2136 = vmatmul.bf16.gmra.mxu0 %v2021_v23 }
 0x56a   : > { %v1935_v24 = vpop.f32.mrf.mxu3 }
 0x56b   : > { %v1936_v29 = vadd.f32 %v3419_v17, %v1935_v24 }
 0x56d   : > { %v1982_v33 = vmax.f32 %v1936_v29, 0.0 }
 0x56e   : > { %v2099_v26 = vpop.f32.mrf.mxu0 }
 0x56f   : > { %v2100_v27 = vadd.f32 %v3454_v0, %v2099_v26 }
 0x571   : > { %2172 = vst [vmem:[%s3457_s23 + $0x28] sm:$0xff] %v2100_v27 }
 0x572   : > { %v1937_v30 = vpop.f32.mrf.mxu3 }
 0x573   : > { %v1938_v31 = vadd.f32 %v3419_v17, %v1937_v30 }
 0x575   : > { %v1983_v34 = vmax.f32 %v1938_v31, 0.0 }
 0x576   : > { %v2102_v35 = vpop.f32.mrf.mxu0 }
 0x577   : > { %v2022_v36 = vpack.c.bf16 %v1983_v34, %v1982_v33  ;;  %v2103_v37 = vadd.f32 %v3454_v0, %v2102_v35 }
 0x579   : > { %2173 = vst [vmem:[%s3457_s23 + $0x30] sm:$0xff] %v2103_v37  ;;  %2141 = vmatmul.bf16.gmra.mxu0 %v2022_v36 }
 0x57a   : > { %v1940_v40 = vpop.f32.mrf.mxu3 }
 0x57b   : > { %v1941_v43 = vadd.f32 %v3419_v17, %v1940_v40 }
 0x57d   : > { %v1984_v47 = vmax.f32 %v1941_v43, 0.0 }
 0x57e   : > { %v2104_v41 = vpop.f32.mrf.mxu0 }
 0x57f   : > { %v2105_v42 = vadd.f32 %v3454_v0, %v2104_v41 }
 0x581   : > { %2174 = vst [vmem:[%s3457_s23 + $0x38] sm:$0xff] %v2105_v42 }
 0x582   : > { %v1942_v45 = vpop.f32.mrf.mxu3 }
 0x583   : > { %v1943_v46 = vadd.f32 %v3419_v17, %v1942_v45 }
 0x585   : > { %v1985_v48 = vmax.f32 %v1943_v46, 0.0 }
 0x586   : > { %v2107_v49 = vpop.f32.mrf.mxu0 }
 0x587   : > { %v2023_v50 = vpack.c.bf16 %v1985_v48, %v1984_v47  ;;  %v2108_v51 = vadd.f32 %v3454_v0, %v2107_v49 }
 0x589   : > { %2175 = vst [vmem:[%s3457_s23 + $0x40] sm:$0xff] %v2108_v51  ;;  %2146 = vmatmul.bf16.gmra.mxu0 %v2023_v50 }
 0x58a   : > { %v1945_v52 = vpop.f32.mrf.mxu3 }
 0x58b   : > { %v1946_v55 = vadd.f32 %v3419_v17, %v1945_v52 }
 0x58d   : > { %v1986_v58 = vmax.f32 %v1946_v55, 0.0 }
 0x58e   : > { %v2109_v53 = vpop.f32.mrf.mxu0 }
 0x58f   : > { %v2110_v54 = vadd.f32 %v3454_v0, %v2109_v53 }
 0x591   : > { %2176 = vst [vmem:[%s3457_s23 + $0x48] sm:$0xff] %v2110_v54 }
 0x592   : > { %v1947_v56 = vpop.f32.mrf.mxu3 }
 0x593   : > { %v1948_v57 = vadd.f32 %v3419_v17, %v1947_v56 }
 0x595   : > { %v1987_v38 = vmax.f32 %v1948_v57, 0.0 }
 0x596   : > { %v2112_v59 = vpop.f32.mrf.mxu0 }
 0x597   : > { %v2024_v60 = vpack.c.bf16 %v1987_v38, %v1986_v58  ;;  %v2113_v61 = vadd.f32 %v3454_v0, %v2112_v59 }
 0x599   : > { %2177 = vst [vmem:[%s3457_s23 + $0x50] sm:$0xff] %v2113_v61  ;;  %2151 = vmatmul.bf16.gmra.mxu0 %v2024_v60 }
 0x59a   : > { %v1950_v62 = vpop.f32.mrf.mxu3 }
 0x59b   : > { %v1951_v2 = vadd.f32 %v3419_v17, %v1950_v62 }
 0x59d   : > { %v1988_v5 = vmax.f32 %v1951_v2, 0.0 }
 0x59e   : > { %v2114_v63 = vpop.f32.mrf.mxu0 }
 0x59f   : > { %v2115_v1 = vadd.f32 %v3454_v0, %v2114_v63 }
 0x5a1   : > { %2178 = vst [vmem:[%s3457_s23 + $0x58] sm:$0xff] %v2115_v1 }
 0x5a2   : > { %v1952_v3 = vpop.f32.mrf.mxu3 }
 0x5a3   : > { %v1953_v4 = vadd.f32 %v3419_v17, %v1952_v3 }
 0x5a5   : > { %v1989_v6 = vmax.f32 %v1953_v4, 0.0 }
 0x5a6   : > { %v2117_v7 = vpop.f32.mrf.mxu0 }
 0x5a7   : > { %v2025_v25 = vpack.c.bf16 %v1989_v6, %v1988_v5  ;;  %v2118_v8 = vadd.f32 %v3454_v0, %v2117_v7 }
 0x5a9   : > { %2179 = vst [vmem:[%s3457_s23 + $0x60] sm:$0xff] %v2118_v8  ;;  %2156 = vmatmul.bf16.gmra.mxu0 %v2025_v25 }
 0x5aa   : > { %v1955_v9 = vpop.f32.mrf.mxu3 }
 0x5ab   : > { %v1956_v12 = vadd.f32 %v3419_v17, %v1955_v9 }
 0x5ad   : > { %v1990_v15 = vmax.f32 %v1956_v12, 0.0 }
 0x5ae   : > { %v2119_v10 = vpop.f32.mrf.mxu0 }
 0x5af   : > { %v2120_v11 = vadd.f32 %v3454_v0, %v2119_v10 }
 0x5b1   : > { %2180 = vst [vmem:[%s3457_s23 + $0x68] sm:$0xff] %v2120_v11 }
 0x5b2   : > { %v1957_v13 = vpop.f32.mrf.mxu3 }
 0x5b3   : > { %v1958_v14 = vadd.f32 %v3419_v17, %v1957_v13 }
 0x5b5   : > { %v1991_v16 = vmax.f32 %v1958_v14, 0.0 }
 0x5b6   : > { %v2122_v32 = vpop.f32.mrf.mxu0 }
 0x5b7   : > { %v2026_v18 = vpack.c.bf16 %v1991_v16, %v1990_v15  ;;  %v2123_v19 = vadd.f32 %v3454_v0, %v2122_v32 }
 0x5b9   : > { %2181 = vst [vmem:[%s3457_s23 + $0x70] sm:$0xff] %v2123_v19  ;;  %2161 = vmatmul.bf16.gmra.mxu0 %v2026_v18 }
 0x5be   : > { %v2124_v20 = vpop.f32.mrf.mxu0 }
 0x5bf   : > { %v2125_v21 = vadd.f32 %v3454_v0, %v2124_v20 }
 0x5c1   : > { %2182 = vst [vmem:[%s3457_s23 + $0x78] sm:$0xff] %v2125_v21 }
 0x5c6   : > { %v2127_v39 = vpop.f32.mrf.mxu0 }
 0x5c7   : > { %v2128_v44 = vadd.f32 %v3454_v0, %v2127_v39 }
 0x5c9   : > { %2183 = vst [vmem:[%s3457_s23 + $0x80] sm:$0xff] %v2128_v44 }
 0x5ce   : > { %v2129_v17 = vpop.f32.mrf.mxu0 }
 0x5cf   : > { %v2130_v22 = vadd.f32 %v3454_v0, %v2129_v17 }
 0x5d1   : > { %2184 = vst [vmem:[%s3457_s23 + $0x88] sm:$0xff] %v2130_v22 }
 0x5d6   : > { %v2132_v23 = vpop.f32.mrf.mxu0 }
 0x5d7   : > { %v2133_v28 = vadd.f32 %v3454_v0, %v2132_v23 }
 0x5d9   : > { %2185 = vst [vmem:[%s3457_s23 + $0x90] sm:$0xff] %v2133_v28 }
 0x5de   : > { %v2134_v24 = vpop.f32.mrf.mxu0 }
 0x5df   : > { %v2135_v26 = vadd.f32 %v3454_v0, %v2134_v24 }
 0x5e1   : > { %2186 = vst [vmem:[%s3457_s23 + $0x98] sm:$0xff] %v2135_v26 }
 0x5e6   : > { %v2137_v27 = vpop.f32.mrf.mxu0 }
 0x5e7   : > { %v2138_v29 = vadd.f32 %v3454_v0, %v2137_v27 }
 0x5e9   : > { %2187 = vst [vmem:[%s3457_s23 + $0xa0] sm:$0xff] %v2138_v29 }
 0x5ee   : > { %v2139_v30 = vpop.f32.mrf.mxu0 }
 0x5ef   : > { %v2140_v31 = vadd.f32 %v3454_v0, %v2139_v30 }
 0x5f1   : > { %2188 = vst [vmem:[%s3457_s23 + $0xa8] sm:$0xff] %v2140_v31 }
 0x5f6   : > { %v2142_v33 = vpop.f32.mrf.mxu0 }
 0x5f7   : > { %v2143_v34 = vadd.f32 %v3454_v0, %v2142_v33 }
 0x5f9   : > { %2189 = vst [vmem:[%s3457_s23 + $0xb0] sm:$0xff] %v2143_v34 }
 0x5fe   : > { %v2144_v35 = vpop.f32.mrf.mxu0 }
 0x5ff   : > { %v2145_v36 = vadd.f32 %v3454_v0, %v2144_v35 }
 0x601   : > { %2190 = vst [vmem:[%s3457_s23 + $0xb8] sm:$0xff] %v2145_v36 }
 0x606   : > { %v2147_v37 = vpop.f32.mrf.mxu0 }
 0x607   : > { %v2148_v40 = vadd.f32 %v3454_v0, %v2147_v37 }
 0x609   : > { %2191 = vst [vmem:[%s3457_s23 + $0xc0] sm:$0xff] %v2148_v40 }
 0x60e   : > { %v2149_v41 = vpop.f32.mrf.mxu0 }
 0x60f   : > { %v2150_v42 = vadd.f32 %v3454_v0, %v2149_v41 }
 0x611   : > { %2192 = vst [vmem:[%s3457_s23 + $0xc8] sm:$0xff] %v2150_v42 }
 0x616   : > { %v2152_v43 = vpop.f32.mrf.mxu0 }
 0x617   : > { %v2153_v45 = vadd.f32 %v3454_v0, %v2152_v43 }
 0x619   : > { %2193 = vst [vmem:[%s3457_s23 + $0xd0] sm:$0xff] %v2153_v45 }
 0x61e   : > { %v2154_v46 = vpop.f32.mrf.mxu0 }
 0x61f   : > { %v2155_v47 = vadd.f32 %v3454_v0, %v2154_v46 }
 0x621   : > { %2194 = vst [vmem:[%s3457_s23 + $0xd8] sm:$0xff] %v2155_v47 }
 0x626   : > { %v2157_v48 = vpop.f32.mrf.mxu0 }
 0x627   : > { %v2158_v49 = vadd.f32 %v3454_v0, %v2157_v48 }
 0x629   : > { %2195 = vst [vmem:[%s3457_s23 + $0xe0] sm:$0xff] %v2158_v49 }
 0x62e   : > { %v2159_v50 = vpop.f32.mrf.mxu0 }
 0x62f   : > { %v2160_v51 = vadd.f32 %v3454_v0, %v2159_v50 }
 0x631   : > { %2196 = vst [vmem:[%s3457_s23 + $0xe8] sm:$0xff] %v2160_v51 }
 0x636   : > { %v2162_v52 = vpop.f32.mrf.mxu0 }
 0x637   : > { %v2163_v53 = vadd.f32 %v3454_v0, %v2162_v52 }
 0x639   : > { %2197 = vst [vmem:[%s3457_s23 + $0xf0] sm:$0xff] %v2163_v53 }
 0x63e   : > { %v2164_v54 = vpop.f32.mrf.mxu0 }
 0x63f   : > { %v2165_v55 = vadd.f32 %v3454_v0, %v2164_v54 }
 0x641   : > { %2198 = vst [vmem:[%s3457_s23 + $0xf8] sm:$0xff] %v2165_v55 }
 0x642   : > { %2990 = shalt.err (!%p2987_p10)
}
 0x643   : > { %s3041_s20 = smov 128   ;;  %s3042_s27 = smov 8  }
 0x644   : > { %2801 = dma.vmem_to_hbm [thread:$0]  (%p3135_p5), %s2213_s5, 4096, %s2215_s6, %s2200_s9, %s3041_s20, %s3041_s20, %s3042_s27  }
 0x645 PF: > { %s2229_s7 = sand.u32 1, %s3021_s12   ;;  %p3579_p12 = scmp.ge.s32.totalorder %s3033_s15, 2 }
 0x646   : > { %s2230_s18 = scalar_lea.sflag [#allocation4], %s2229_s7 }
 0x647   : > { %p2815_p13 = pnand %p3579_p12, %p3098_p6 }
 0x649   : > { %p2816_p0 = pneg %p2815_p13 }
 0x64b   : > { %3016 = dma.done.wait (%p2816_p0), %s2230_s18, 4096  }
 0x64c   : > { %3018 = vsyncadd (%p2816_p0), %s2230_s18, 4294963200  ;;  %p17_p3 = scmp.ge.s32.totalorder %s3122_s8, 4   ;;  %s3580_s12 = smov %s3025_s13 }
 0x64d   : > { %s3581_s13 = smov %s3029_s14  ;;  %s3582_s14 = smov %s3131_s11 }
 0x64e   : > { %s3583_s15 = smov %s3122_s8  ;;  %19 = sbr.rel (!%p17_p3) target bundleno = 6 (0x6), region = 101 }
 0x653   :  { %2236 = vsyncpa [#allocation3], 1 }
 0x654   :  { %2238 = vsyncpa [#allocation3 + $0x1], 1 }
 0x655   :  { %2239 = vsyncpa [#allocation6], 1 }
 0x656   :  { %2240 = vsyncpa [#allocation4], 1 }
 0x657   :  { %2242 = vsyncpa [#allocation4 + $0x1], 1 }

</bundles_post_ra>
